<compile_context>
chip_gen: v7x
topology: tpu7x:2x2x1
jax: 0.10.0
libtpu: 0.0.40
codegen_flags: <defaults>
</compile_context>

<pallas_src>
import functools

import jax
import jax.numpy as jnp
from jax import lax
from jax.experimental import pallas as pl
from jax.experimental.pallas import tpu as pltpu


def _make_divisible(v, divisor=8, min_value=None):
    if min_value is None:
        min_value = divisor
    new_v = max(min_value, int(v + divisor / 2) // divisor * divisor)
    if new_v < 0.9 * v:
        new_v += divisor
    return new_v


_BT = 2  # batch elements per grid step


# ---------------------------------------------------------------------------
# Pallas kernel: one grid step == Bt batch elements, (C, pixels) layout.
# ---------------------------------------------------------------------------
def _dep_sep_conv_kernel(x_ref, wdw_ref, b1_ref, mask_ref, wse1_ref, bse1_ref,
                         wse2_ref, bse2_ref, wpw_ref, b2_ref, out_ref,
                         *, Bt, Npix, Wslack, Wp, K, pad, inv_hw):
    # Load tiny constants once per grid step; slice them in registers below.
    wdw = wdw_ref[...]            # (C_in, K*K)   depthwise taps, BN1 scale folded
    b1 = b1_ref[...]              # (C_in, 1)     BN1 bias
    mask = mask_ref[...]          # (1, Npix)     1.0 on interior pixels
    wse1 = wse1_ref[...]          # (C_in, C_hid) SE fc1 weight (transposed)
    bse1 = bse1_ref[...]          # (1, C_hid)
    wse2 = wse2_ref[...]          # (C_in, C_hid) SE fc2 weight
    bse2 = bse2_ref[...]          # (C_in, 1)
    wpw = wpw_ref[...]            # (C_out, C_in) bf16, BN2 scale folded
    b2 = b2_ref[...]              # (C_out, 1)    BN2 bias

    for i in range(Bt):           # small static unroll
        xb = x_ref[i]             # (C_in, Nw) padded+slacked pixel slab, loaded once

        # --- depthwise KxK conv, stride 1: each tap is a lane-shifted window ---
        acc = None
        for kh in range(K):
            for kw in range(K):
                t = kh * K + kw
                off = (kh - pad) * Wp + (kw - pad)
                win = xb[:, Wslack + off:Wslack + off + Npix]      # (C_in, Npix)
                term = win * wdw[:, t:t + 1]
                acc = term if acc is None else acc + term

        # --- BN1 bias + HardSwish ---
        h = acc + b1
        h = h * (jnp.clip(h + 3.0, 0.0, 6.0) * (1.0 / 6.0))

        # --- SE: masked global avg-pool + two tiny 1x1 convs on the VPU/XLU ---
        pooled = jnp.sum(h * mask, axis=1, keepdims=True) * inv_hw  # (C_in, 1)
        z = jnp.sum(wse1 * pooled, axis=0, keepdims=True) + bse1    # (1, C_hid)
        z = jnp.maximum(z, 0.0)
        s = jnp.sum(wse2 * z, axis=1, keepdims=True) + bse2         # (C_in, 1)
        s = jnp.clip(s + 3.0, 0.0, 6.0) * (1.0 / 6.0)               # HardSigmoid
        h = h * s

        # --- pointwise 1x1 conv: natural (C_out,C_in)@(C_in,Npix) bf16 matmul ---
        o = jnp.dot(wpw, h.astype(jnp.bfloat16),
                    preferred_element_type=jnp.float32)             # (C_out, Npix)
        o = o + b2
        o = o * (jnp.clip(o + 3.0, 0.0, 6.0) * (1.0 / 6.0))         # HardSwish
        out_ref[i] = o                                              # lane-dense store


# ---------------------------------------------------------------------------
# Wrapper: BN folding + layout plumbing (all contiguous pads/reshapes, no
# transposes), then one pallas_call over the batch.
# ---------------------------------------------------------------------------
@jax.jit
def dep_sep_conv_pallas(x_nchw, p):
    B, C_in, H, W = x_nchw.shape
    K = p["w_dw"].shape[2]
    pad = (K - 1) // 2
    C_out = p["w_pw"].shape[0]
    C_hid = p["w_se1"].shape[0]
    eps = 1e-5

    Hp, Wp = H + 2 * pad, W + 2 * pad
    Npix = Hp * Wp
    Wslack = pad * Wp + pad          # max |lane shift| used by the depthwise taps
    Nw = Npix + 2 * Wslack

    # batch blocking: Bt images per grid step (pad batch to a multiple of Bt)
    Bt = min(_BT, B)
    Bpad = (-B) % Bt
    if Bpad:
        x_nchw = jnp.pad(x_nchw, ((0, Bpad), (0, 0), (0, 0), (0, 0)))
    Bp = B + Bpad

    # ---- input slab: NCHW -> spatial pad -> flatten pixels -> zero slack ----
    # (all pads + a contiguous reshape: one fused XLA op, no transposes)
    xpad = jnp.pad(x_nchw, ((0, 0), (0, 0), (pad, pad), (pad, pad)))
    xslab = jnp.pad(xpad.reshape(Bp, C_in, Npix),
                    ((0, 0), (0, 0), (Wslack, Wslack)))             # (Bp, C_in, Nw)

    # ---- depthwise taps with BN1 scale folded; BN1 bias column ----
    inv1 = p["bn1_g"] / jnp.sqrt(p["bn1_v"] + eps)
    wdw = p["w_dw"][:, 0].reshape(C_in, K * K) * inv1[:, None]      # (C_in, K*K)
    b1 = (p["bn1_b"] - p["bn1_m"] * inv1).reshape(C_in, 1)

    # ---- interior-pixel mask for the SE global average pool ----
    mask = (jnp.zeros((Hp, Wp), jnp.float32)
            .at[pad:pad + H, pad:pad + W].set(1.0).reshape(1, Npix))

    # ---- SE weights (tiny, kept f32, shaped for VPU/XLU reductions) ----
    wse1T = p["w_se1"][:, :, 0, 0].T                                # (C_in, C_hid)
    bse1 = p["b_se1"].reshape(1, C_hid)
    wse2 = p["w_se2"][:, :, 0, 0]                                   # (C_in, C_hid)
    bse2 = p["b_se2"].reshape(C_in, 1)

    # ---- pointwise weight with BN2 scale folded, stored bf16 for the MXU ----
    inv2 = p["bn2_g"] / jnp.sqrt(p["bn2_v"] + eps)
    wpw = (p["w_pw"][:, :, 0, 0] * inv2[:, None]).astype(jnp.bfloat16)  # (C_out, C_in)
    b2 = (p["bn2_b"] - p["bn2_m"] * inv2).reshape(C_out, 1)

    kernel = functools.partial(_dep_sep_conv_kernel, Bt=Bt, Npix=Npix,
                               Wslack=Wslack, Wp=Wp, K=K, pad=pad,
                               inv_hw=1.0 / (H * W))

    def const(shape):
        return pl.BlockSpec(shape, lambda g: (0,) * len(shape))

    out_flat = pl.pallas_call(
        kernel,
        out_shape=jax.ShapeDtypeStruct((Bp, C_out, Npix), jnp.float32),
        grid=(Bp // Bt,),
        in_specs=[
            pl.BlockSpec((Bt, C_in, Nw), lambda g: (g, 0, 0)),
            const((C_in, K * K)),
            const((C_in, 1)),
            const((1, Npix)),
            const((C_in, C_hid)),
            const((1, C_hid)),
            const((C_in, C_hid)),
            const((C_in, 1)),
            const((C_out, C_in)),
            const((C_out, 1)),
        ],
        out_specs=pl.BlockSpec((Bt, C_out, Npix), lambda g: (g, 0, 0)),
        compiler_params=pltpu.CompilerParams(
            dimension_semantics=("parallel",),
            vmem_limit_bytes=32 * 1024 * 1024),
    )(xslab, wdw, b1, mask, wse1T, bse1, wse2, bse2, wpw, b2)

    # padded-pixel layout -> NCHW interior (single XLA slice; a following
    # DepSepConv block could instead consume the padded layout directly)
    out = out_flat.reshape(Bp, C_out, Hp, Wp)[:B, :, pad:pad + H, pad:pad + W]
    return out


# ---------------------------------------------------------------------------
# Pure-JAX reference (NCHW, mirrors the PyTorch module in eval mode)
# ---------------------------------------------------------------------------
def dep_sep_conv_ref(x, p):
    eps = 1e-5

    def hswish(v):
        return v * jnp.clip(v + 3.0, 0.0, 6.0) / 6.0

    def hsig(v):
        return jnp.clip(v + 3.0, 0.0, 6.0) / 6.0

    def bn(v, g, b, m, var):
        g, b, m, var = (t[None, :, None, None] for t in (g, b, m, var))
        return (v - m) / jnp.sqrt(var + eps) * g + b

    C_in = x.shape[1]
    K = p["w_dw"].shape[2]
    pad = (K - 1) // 2
    dn = ("NCHW", "OIHW", "NCHW")

    h = lax.conv_general_dilated(x, p["w_dw"], (1, 1), ((pad, pad), (pad, pad)),
                                 feature_group_count=C_in, dimension_numbers=dn)
    h = hswish(bn(h, p["bn1_g"], p["bn1_b"], p["bn1_m"], p["bn1_v"]))

    y = jnp.mean(h, axis=(2, 3), keepdims=True)
    y = lax.conv_general_dilated(y, p["w_se1"], (1, 1), ((0, 0), (0, 0)),
                                 dimension_numbers=dn) + p["b_se1"][None, :, None, None]
    y = jnp.maximum(y, 0.0)
    y = lax.conv_general_dilated(y, p["w_se2"], (1, 1), ((0, 0), (0, 0)),
                                 dimension_numbers=dn) + p["b_se2"][None, :, None, None]
    h = h * hsig(y)

    o = lax.conv_general_dilated(h, p["w_pw"], (1, 1), ((0, 0), (0, 0)),
                                 dimension_numbers=dn)
    return hswish(bn(o, p["bn2_g"], p["bn2_b"], p["bn2_m"], p["bn2_v"]))


# ---------------------------------------------------------------------------
if __name__ == "__main__":
    B, C_in, H, W = 8, 16, 16, 16
    C_out, K = 32, 3
    C_hid = _make_divisible(C_in // 4)   # SE hidden channels

    key = jax.random.PRNGKey(0)
    ks = jax.random.split(key, 16)

    p = {
        "w_dw": 0.2 * jax.random.normal(ks[0], (C_in, 1, K, K), jnp.float32),
        "bn1_g": 1.0 + 0.1 * jax.random.normal(ks[1], (C_in,), jnp.float32),
        "bn1_b": 0.1 * jax.random.normal(ks[2], (C_in,), jnp.float32),
        "bn1_m": 0.1 * jax.random.normal(ks[3], (C_in,), jnp.float32),
        "bn1_v": jax.random.uniform(ks[4], (C_in,), jnp.float32, 0.5, 1.5),
        "w_se1": 0.2 * jax.random.normal(ks[5], (C_hid, C_in, 1, 1), jnp.float32),
        "b_se1": 0.1 * jax.random.normal(ks[6], (C_hid,), jnp.float32),
        "w_se2": 0.2 * jax.random.normal(ks[7], (C_in, C_hid, 1, 1), jnp.float32),
        "b_se2": 0.1 * jax.random.normal(ks[8], (C_in,), jnp.float32),
        "w_pw": 0.2 * jax.random.normal(ks[9], (C_out, C_in, 1, 1), jnp.float32),
        "bn2_g": 1.0 + 0.1 * jax.random.normal(ks[10], (C_out,), jnp.float32),
        "bn2_b": 0.1 * jax.random.normal(ks[11], (C_out,), jnp.float32),
        "bn2_m": 0.1 * jax.random.normal(ks[12], (C_out,), jnp.float32),
        "bn2_v": jax.random.uniform(ks[13], (C_out,), jnp.float32, 0.5, 1.5),
    }

    x = jax.random.normal(ks[14], (B, C_in, H, W), jnp.float32)   # NCHW like PyTorch

    out = jax.block_until_ready(dep_sep_conv_pallas(x, p))
    ref = jax.block_until_ready(dep_sep_conv_ref(x, p))

    assert out.shape == (B, C_out, H, W), out.shape
    # tolerance widened vs. v2 because the pointwise matmul uses bf16 MXU
    # operands (f32 accumulation)
    max_err = float(jnp.max(jnp.abs(out - ref)))
    assert jnp.allclose(out, ref, atol=5e-2, rtol=5e-2), max_err
    print("KERNEL_OK")
</pallas_src>

<mosaic_0001>
module attributes {stable_mosaic.version = 11 : i64} {
  func.func @_dep_sep_conv_kernel(%arg0: i32, %arg1: memref<2x16x362xf32, #tpu.memory_space<vmem>>, %arg2: memref<16x9xf32, #tpu.memory_space<vmem>>, %arg3: memref<16x1xf32, #tpu.memory_space<vmem>>, %arg4: memref<1x324xf32, #tpu.memory_space<vmem>>, %arg5: memref<16x8xf32, #tpu.memory_space<vmem>>, %arg6: memref<1x8xf32, #tpu.memory_space<vmem>>, %arg7: memref<16x8xf32, #tpu.memory_space<vmem>>, %arg8: memref<16x1xf32, #tpu.memory_space<vmem>>, %arg9: memref<32x16xbf16, #tpu.memory_space<vmem>>, %arg10: memref<32x1xf32, #tpu.memory_space<vmem>>, %arg11: memref<2x32x324xf32, #tpu.memory_space<vmem>>) attributes {dimension_semantics = [#tpu.dimension_semantics<parallel>], iteration_bounds = array<i64: 4>, scalar_prefetch = 0 : i64, scratch_operands = 0 : i64, tpu.core_type = #tpu.core_type<tc>, window_params = [{transform_indices = @transform_0, window_bounds = array<i64: 2, 16, 362>}, {pipeline_mode = #tpu.pipeline_mode<synchronous>, transform_indices = @transform_1, window_bounds = array<i64: 16, 9>}, {pipeline_mode = #tpu.pipeline_mode<synchronous>, transform_indices = @transform_2, window_bounds = array<i64: 16, 1>}, {pipeline_mode = #tpu.pipeline_mode<synchronous>, transform_indices = @transform_3, window_bounds = array<i64: 1, 324>}, {pipeline_mode = #tpu.pipeline_mode<synchronous>, transform_indices = @transform_4, window_bounds = array<i64: 16, 8>}, {pipeline_mode = #tpu.pipeline_mode<synchronous>, transform_indices = @transform_5, window_bounds = array<i64: 1, 8>}, {pipeline_mode = #tpu.pipeline_mode<synchronous>, transform_indices = @transform_6, window_bounds = array<i64: 16, 8>}, {pipeline_mode = #tpu.pipeline_mode<synchronous>, transform_indices = @transform_7, window_bounds = array<i64: 16, 1>}, {pipeline_mode = #tpu.pipeline_mode<synchronous>, transform_indices = @transform_8, window_bounds = array<i64: 32, 16>}, {pipeline_mode = #tpu.pipeline_mode<synchronous>, transform_indices = @transform_9, window_bounds = array<i64: 32, 1>}, {transform_indices = @transform_10, window_bounds = array<i64: 2, 32, 324>}]} {
    %c0 = arith.constant 0 : index
    %c0_0 = arith.constant 0 : index
    %0 = vector.load %arg2[%c0, %c0_0] : memref<16x9xf32, #tpu.memory_space<vmem>>, vector<16x9xf32>
    %c0_1 = arith.constant 0 : index
    %c0_2 = arith.constant 0 : index
    %1 = vector.load %arg3[%c0_1, %c0_2] : memref<16x1xf32, #tpu.memory_space<vmem>>, vector<16x1xf32>
    %c0_3 = arith.constant 0 : index
    %c0_4 = arith.constant 0 : index
    %2 = vector.load %arg4[%c0_3, %c0_4] : memref<1x324xf32, #tpu.memory_space<vmem>>, vector<1x324xf32>
    %c0_5 = arith.constant 0 : index
    %c0_6 = arith.constant 0 : index
    %3 = vector.load %arg5[%c0_5, %c0_6] : memref<16x8xf32, #tpu.memory_space<vmem>>, vector<16x8xf32>
    %c0_7 = arith.constant 0 : index
    %c0_8 = arith.constant 0 : index
    %4 = vector.load %arg6[%c0_7, %c0_8] : memref<1x8xf32, #tpu.memory_space<vmem>>, vector<1x8xf32>
    %c0_9 = arith.constant 0 : index
    %c0_10 = arith.constant 0 : index
    %5 = vector.load %arg7[%c0_9, %c0_10] : memref<16x8xf32, #tpu.memory_space<vmem>>, vector<16x8xf32>
    %c0_11 = arith.constant 0 : index
    %c0_12 = arith.constant 0 : index
    %6 = vector.load %arg8[%c0_11, %c0_12] : memref<16x1xf32, #tpu.memory_space<vmem>>, vector<16x1xf32>
    %c0_13 = arith.constant 0 : index
    %c0_14 = arith.constant 0 : index
    %7 = vector.load %arg9[%c0_13, %c0_14] : memref<32x16xbf16, #tpu.memory_space<vmem>>, vector<32x16xbf16>
    %c0_15 = arith.constant 0 : index
    %c0_16 = arith.constant 0 : index
    %8 = vector.load %arg10[%c0_15, %c0_16] : memref<32x1xf32, #tpu.memory_space<vmem>>, vector<32x1xf32>
    %c0_17 = arith.constant 0 : index
    %c0_18 = arith.constant 0 : index
    %c0_19 = arith.constant 0 : index
    %9 = vector.load %arg1[%c0_17, %c0_18, %c0_19] : memref<2x16x362xf32, #tpu.memory_space<vmem>>, vector<1x16x362xf32>
    %10 = vector.shape_cast %9 : vector<1x16x362xf32> to vector<16x362xf32>
    %11 = vector.extract_strided_slice %10 {offsets = [0, 0], sizes = [16, 324], strides = [1, 1]} : vector<16x362xf32> to vector<16x324xf32>
    %12 = vector.extract_strided_slice %0 {offsets = [0, 0], sizes = [16, 1], strides = [1, 1]} : vector<16x9xf32> to vector<16x1xf32>
    %13 = vector.broadcast %12 : vector<16x1xf32> to vector<16x324xf32>
    %14 = arith.mulf %11, %13 : vector<16x324xf32>
    %15 = vector.extract_strided_slice %10 {offsets = [0, 1], sizes = [16, 324], strides = [1, 1]} : vector<16x362xf32> to vector<16x324xf32>
    %16 = vector.extract_strided_slice %0 {offsets = [0, 1], sizes = [16, 1], strides = [1, 1]} : vector<16x9xf32> to vector<16x1xf32>
    %17 = vector.broadcast %16 : vector<16x1xf32> to vector<16x324xf32>
    %18 = arith.mulf %15, %17 : vector<16x324xf32>
    %19 = arith.addf %14, %18 : vector<16x324xf32>
    %20 = vector.extract_strided_slice %10 {offsets = [0, 2], sizes = [16, 324], strides = [1, 1]} : vector<16x362xf32> to vector<16x324xf32>
    %21 = vector.extract_strided_slice %0 {offsets = [0, 2], sizes = [16, 1], strides = [1, 1]} : vector<16x9xf32> to vector<16x1xf32>
    %22 = vector.broadcast %21 : vector<16x1xf32> to vector<16x324xf32>
    %23 = arith.mulf %20, %22 : vector<16x324xf32>
    %24 = arith.addf %19, %23 : vector<16x324xf32>
    %25 = vector.extract_strided_slice %10 {offsets = [0, 18], sizes = [16, 324], strides = [1, 1]} : vector<16x362xf32> to vector<16x324xf32>
    %26 = vector.extract_strided_slice %0 {offsets = [0, 3], sizes = [16, 1], strides = [1, 1]} : vector<16x9xf32> to vector<16x1xf32>
    %27 = vector.broadcast %26 : vector<16x1xf32> to vector<16x324xf32>
    %28 = arith.mulf %25, %27 : vector<16x324xf32>
    %29 = arith.addf %24, %28 : vector<16x324xf32>
    %30 = vector.extract_strided_slice %10 {offsets = [0, 19], sizes = [16, 324], strides = [1, 1]} : vector<16x362xf32> to vector<16x324xf32>
    %31 = vector.extract_strided_slice %0 {offsets = [0, 4], sizes = [16, 1], strides = [1, 1]} : vector<16x9xf32> to vector<16x1xf32>
    %32 = vector.broadcast %31 : vector<16x1xf32> to vector<16x324xf32>
    %33 = arith.mulf %30, %32 : vector<16x324xf32>
    %34 = arith.addf %29, %33 : vector<16x324xf32>
    %35 = vector.extract_strided_slice %10 {offsets = [0, 20], sizes = [16, 324], strides = [1, 1]} : vector<16x362xf32> to vector<16x324xf32>
    %36 = vector.extract_strided_slice %0 {offsets = [0, 5], sizes = [16, 1], strides = [1, 1]} : vector<16x9xf32> to vector<16x1xf32>
    %37 = vector.broadcast %36 : vector<16x1xf32> to vector<16x324xf32>
    %38 = arith.mulf %35, %37 : vector<16x324xf32>
    %39 = arith.addf %34, %38 : vector<16x324xf32>
    %40 = vector.extract_strided_slice %10 {offsets = [0, 36], sizes = [16, 324], strides = [1, 1]} : vector<16x362xf32> to vector<16x324xf32>
    %41 = vector.extract_strided_slice %0 {offsets = [0, 6], sizes = [16, 1], strides = [1, 1]} : vector<16x9xf32> to vector<16x1xf32>
    %42 = vector.broadcast %41 : vector<16x1xf32> to vector<16x324xf32>
    %43 = arith.mulf %40, %42 : vector<16x324xf32>
    %44 = arith.addf %39, %43 : vector<16x324xf32>
    %45 = vector.extract_strided_slice %10 {offsets = [0, 37], sizes = [16, 324], strides = [1, 1]} : vector<16x362xf32> to vector<16x324xf32>
    %46 = vector.extract_strided_slice %0 {offsets = [0, 7], sizes = [16, 1], strides = [1, 1]} : vector<16x9xf32> to vector<16x1xf32>
    %47 = vector.broadcast %46 : vector<16x1xf32> to vector<16x324xf32>
    %48 = arith.mulf %45, %47 : vector<16x324xf32>
    %49 = arith.addf %44, %48 : vector<16x324xf32>
    %50 = vector.extract_strided_slice %10 {offsets = [0, 38], sizes = [16, 324], strides = [1, 1]} : vector<16x362xf32> to vector<16x324xf32>
    %51 = vector.extract_strided_slice %0 {offsets = [0, 8], sizes = [16, 1], strides = [1, 1]} : vector<16x9xf32> to vector<16x1xf32>
    %52 = vector.broadcast %51 : vector<16x1xf32> to vector<16x324xf32>
    %53 = arith.mulf %50, %52 : vector<16x324xf32>
    %54 = arith.addf %49, %53 : vector<16x324xf32>
    %55 = vector.broadcast %1 : vector<16x1xf32> to vector<16x324xf32>
    %56 = arith.addf %54, %55 : vector<16x324xf32>
    %cst = arith.constant 3.000000e+00 : f32
    %57 = vector.broadcast %cst : f32 to vector<16x324xf32>
    %58 = arith.addf %56, %57 : vector<16x324xf32>
    %cst_20 = arith.constant 0.000000e+00 : f32
    %cst_21 = arith.constant 6.000000e+00 : f32
    %59 = vector.broadcast %cst_20 : f32 to vector<16x324xf32>
    %60 = arith.maximumf %59, %58 : vector<16x324xf32>
    %61 = vector.broadcast %cst_21 : f32 to vector<16x324xf32>
    %62 = arith.minimumf %61, %60 : vector<16x324xf32>
    %cst_22 = arith.constant 0.166666672 : f32
    %63 = vector.broadcast %cst_22 : f32 to vector<16x324xf32>
    %64 = arith.mulf %62, %63 : vector<16x324xf32>
    %65 = arith.mulf %56, %64 : vector<16x324xf32>
    %66 = vector.broadcast %2 : vector<1x324xf32> to vector<16x324xf32>
    %67 = arith.mulf %65, %66 : vector<16x324xf32>
    %cst_23 = arith.constant dense<0.000000e+00> : vector<16xf32>
    %68 = vector.multi_reduction <add>, %67, %cst_23 [1] : vector<16x324xf32> to vector<16xf32>
    %69 = vector.shape_cast %68 : vector<16xf32> to vector<16x1xf32>
    %cst_24 = arith.constant 3.906250e-03 : f32
    %70 = vector.broadcast %cst_24 : f32 to vector<16x1xf32>
    %71 = arith.mulf %69, %70 : vector<16x1xf32>
    %72 = vector.broadcast %71 : vector<16x1xf32> to vector<16x8xf32>
    %73 = arith.mulf %3, %72 : vector<16x8xf32>
    %cst_25 = arith.constant dense<0.000000e+00> : vector<8xf32>
    %74 = vector.multi_reduction <add>, %73, %cst_25 [0] : vector<16x8xf32> to vector<8xf32>
    %75 = vector.shape_cast %74 : vector<8xf32> to vector<1x8xf32>
    %76 = arith.addf %75, %4 : vector<1x8xf32>
    %cst_26 = arith.constant 0.000000e+00 : f32
    %77 = vector.broadcast %cst_26 : f32 to vector<1x8xf32>
    %78 = arith.maximumf %76, %77 : vector<1x8xf32>
    %79 = vector.broadcast %78 : vector<1x8xf32> to vector<16x8xf32>
    %80 = arith.mulf %5, %79 : vector<16x8xf32>
    %cst_27 = arith.constant dense<0.000000e+00> : vector<16xf32>
    %81 = vector.multi_reduction <add>, %80, %cst_27 [1] : vector<16x8xf32> to vector<16xf32>
    %82 = vector.shape_cast %81 : vector<16xf32> to vector<16x1xf32>
    %83 = arith.addf %82, %6 : vector<16x1xf32>
    %cst_28 = arith.constant 3.000000e+00 : f32
    %84 = vector.broadcast %cst_28 : f32 to vector<16x1xf32>
    %85 = arith.addf %83, %84 : vector<16x1xf32>
    %cst_29 = arith.constant 0.000000e+00 : f32
    %cst_30 = arith.constant 6.000000e+00 : f32
    %86 = vector.broadcast %cst_29 : f32 to vector<16x1xf32>
    %87 = arith.maximumf %86, %85 : vector<16x1xf32>
    %88 = vector.broadcast %cst_30 : f32 to vector<16x1xf32>
    %89 = arith.minimumf %88, %87 : vector<16x1xf32>
    %cst_31 = arith.constant 0.166666672 : f32
    %90 = vector.broadcast %cst_31 : f32 to vector<16x1xf32>
    %91 = arith.mulf %89, %90 : vector<16x1xf32>
    %92 = vector.broadcast %91 : vector<16x1xf32> to vector<16x324xf32>
    %93 = arith.mulf %65, %92 : vector<16x324xf32>
    %94 = arith.truncf %93 : vector<16x324xf32> to vector<16x324xbf16>
    %cst_32 = arith.constant dense<0.000000e+00> : vector<32x324xf32>
    %95 = tpu.matmul %7, %94, %cst_32 {dimension_numbers = #tpu.dot_dimension_numbers<[1], [0], [0], [1], [0, 0, 1, 1], [], []>} : vector<32x16xbf16>, vector<16x324xbf16>, vector<32x324xf32> -> vector<32x324xf32>
    %96 = vector.broadcast %8 : vector<32x1xf32> to vector<32x324xf32>
    %97 = arith.addf %95, %96 : vector<32x324xf32>
    %cst_33 = arith.constant 3.000000e+00 : f32
    %98 = vector.broadcast %cst_33 : f32 to vector<32x324xf32>
    %99 = arith.addf %97, %98 : vector<32x324xf32>
    %cst_34 = arith.constant 0.000000e+00 : f32
    %cst_35 = arith.constant 6.000000e+00 : f32
    %100 = vector.broadcast %cst_34 : f32 to vector<32x324xf32>
    %101 = arith.maximumf %100, %99 : vector<32x324xf32>
    %102 = vector.broadcast %cst_35 : f32 to vector<32x324xf32>
    %103 = arith.minimumf %102, %101 : vector<32x324xf32>
    %cst_36 = arith.constant 0.166666672 : f32
    %104 = vector.broadcast %cst_36 : f32 to vector<32x324xf32>
    %105 = arith.mulf %103, %104 : vector<32x324xf32>
    %106 = arith.mulf %97, %105 : vector<32x324xf32>
    %c0_37 = arith.constant 0 : index
    %c0_38 = arith.constant 0 : index
    %c0_39 = arith.constant 0 : index
    %107 = vector.load %arg11[%c0_37, %c0_38, %c0_39] : memref<2x32x324xf32, #tpu.memory_space<vmem>>, vector<1x32x324xf32>
    %108 = vector.shape_cast %107 : vector<1x32x324xf32> to vector<32x324xf32>
    %109 = vector.shape_cast %106 : vector<32x324xf32> to vector<1x32x324xf32>
    tpu.vector_store %arg11[%c0_37, %c0_38, %c0_39], %109 {strides = array<i32>} : memref<2x32x324xf32, #tpu.memory_space<vmem>>, vector<1x32x324xf32>,
    %c1 = arith.constant 1 : index
    %c0_40 = arith.constant 0 : index
    %c0_41 = arith.constant 0 : index
    %110 = vector.load %arg1[%c1, %c0_40, %c0_41] : memref<2x16x362xf32, #tpu.memory_space<vmem>>, vector<1x16x362xf32>
    %111 = vector.shape_cast %110 : vector<1x16x362xf32> to vector<16x362xf32>
    %112 = vector.extract_strided_slice %111 {offsets = [0, 0], sizes = [16, 324], strides = [1, 1]} : vector<16x362xf32> to vector<16x324xf32>
    %113 = vector.extract_strided_slice %0 {offsets = [0, 0], sizes = [16, 1], strides = [1, 1]} : vector<16x9xf32> to vector<16x1xf32>
    %114 = vector.broadcast %113 : vector<16x1xf32> to vector<16x324xf32>
    %115 = arith.mulf %112, %114 : vector<16x324xf32>
    %116 = vector.extract_strided_slice %111 {offsets = [0, 1], sizes = [16, 324], strides = [1, 1]} : vector<16x362xf32> to vector<16x324xf32>
    %117 = vector.extract_strided_slice %0 {offsets = [0, 1], sizes = [16, 1], strides = [1, 1]} : vector<16x9xf32> to vector<16x1xf32>
    %118 = vector.broadcast %117 : vector<16x1xf32> to vector<16x324xf32>
    %119 = arith.mulf %116, %118 : vector<16x324xf32>
    %120 = arith.addf %115, %119 : vector<16x324xf32>
    %121 = vector.extract_strided_slice %111 {offsets = [0, 2], sizes = [16, 324], strides = [1, 1]} : vector<16x362xf32> to vector<16x324xf32>
    %122 = vector.extract_strided_slice %0 {offsets = [0, 2], sizes = [16, 1], strides = [1, 1]} : vector<16x9xf32> to vector<16x1xf32>
    %123 = vector.broadcast %122 : vector<16x1xf32> to vector<16x324xf32>
    %124 = arith.mulf %121, %123 : vector<16x324xf32>
    %125 = arith.addf %120, %124 : vector<16x324xf32>
    %126 = vector.extract_strided_slice %111 {offsets = [0, 18], sizes = [16, 324], strides = [1, 1]} : vector<16x362xf32> to vector<16x324xf32>
    %127 = vector.extract_strided_slice %0 {offsets = [0, 3], sizes = [16, 1], strides = [1, 1]} : vector<16x9xf32> to vector<16x1xf32>
    %128 = vector.broadcast %127 : vector<16x1xf32> to vector<16x324xf32>
    %129 = arith.mulf %126, %128 : vector<16x324xf32>
    %130 = arith.addf %125, %129 : vector<16x324xf32>
    %131 = vector.extract_strided_slice %111 {offsets = [0, 19], sizes = [16, 324], strides = [1, 1]} : vector<16x362xf32> to vector<16x324xf32>
    %132 = vector.extract_strided_slice %0 {offsets = [0, 4], sizes = [16, 1], strides = [1, 1]} : vector<16x9xf32> to vector<16x1xf32>
    %133 = vector.broadcast %132 : vector<16x1xf32> to vector<16x324xf32>
    %134 = arith.mulf %131, %133 : vector<16x324xf32>
    %135 = arith.addf %130, %134 : vector<16x324xf32>
    %136 = vector.extract_strided_slice %111 {offsets = [0, 20], sizes = [16, 324], strides = [1, 1]} : vector<16x362xf32> to vector<16x324xf32>
    %137 = vector.extract_strided_slice %0 {offsets = [0, 5], sizes = [16, 1], strides = [1, 1]} : vector<16x9xf32> to vector<16x1xf32>
    %138 = vector.broadcast %137 : vector<16x1xf32> to vector<16x324xf32>
    %139 = arith.mulf %136, %138 : vector<16x324xf32>
    %140 = arith.addf %135, %139 : vector<16x324xf32>
    %141 = vector.extract_strided_slice %111 {offsets = [0, 36], sizes = [16, 324], strides = [1, 1]} : vector<16x362xf32> to vector<16x324xf32>
    %142 = vector.extract_strided_slice %0 {offsets = [0, 6], sizes = [16, 1], strides = [1, 1]} : vector<16x9xf32> to vector<16x1xf32>
    %143 = vector.broadcast %142 : vector<16x1xf32> to vector<16x324xf32>
    %144 = arith.mulf %141, %143 : vector<16x324xf32>
    %145 = arith.addf %140, %144 : vector<16x324xf32>
    %146 = vector.extract_strided_slice %111 {offsets = [0, 37], sizes = [16, 324], strides = [1, 1]} : vector<16x362xf32> to vector<16x324xf32>
    %147 = vector.extract_strided_slice %0 {offsets = [0, 7], sizes = [16, 1], strides = [1, 1]} : vector<16x9xf32> to vector<16x1xf32>
    %148 = vector.broadcast %147 : vector<16x1xf32> to vector<16x324xf32>
    %149 = arith.mulf %146, %148 : vector<16x324xf32>
    %150 = arith.addf %145, %149 : vector<16x324xf32>
    %151 = vector.extract_strided_slice %111 {offsets = [0, 38], sizes = [16, 324], strides = [1, 1]} : vector<16x362xf32> to vector<16x324xf32>
    %152 = vector.extract_strided_slice %0 {offsets = [0, 8], sizes = [16, 1], strides = [1, 1]} : vector<16x9xf32> to vector<16x1xf32>
    %153 = vector.broadcast %152 : vector<16x1xf32> to vector<16x324xf32>
    %154 = arith.mulf %151, %153 : vector<16x324xf32>
    %155 = arith.addf %150, %154 : vector<16x324xf32>
    %156 = vector.broadcast %1 : vector<16x1xf32> to vector<16x324xf32>
    %157 = arith.addf %155, %156 : vector<16x324xf32>
    %cst_42 = arith.constant 3.000000e+00 : f32
    %158 = vector.broadcast %cst_42 : f32 to vector<16x324xf32>
    %159 = arith.addf %157, %158 : vector<16x324xf32>
    %cst_43 = arith.constant 0.000000e+00 : f32
    %cst_44 = arith.constant 6.000000e+00 : f32
    %160 = vector.broadcast %cst_43 : f32 to vector<16x324xf32>
    %161 = arith.maximumf %160, %159 : vector<16x324xf32>
    %162 = vector.broadcast %cst_44 : f32 to vector<16x324xf32>
    %163 = arith.minimumf %162, %161 : vector<16x324xf32>
    %cst_45 = arith.constant 0.166666672 : f32
    %164 = vector.broadcast %cst_45 : f32 to vector<16x324xf32>
    %165 = arith.mulf %163, %164 : vector<16x324xf32>
    %166 = arith.mulf %157, %165 : vector<16x324xf32>
    %167 = vector.broadcast %2 : vector<1x324xf32> to vector<16x324xf32>
    %168 = arith.mulf %166, %167 : vector<16x324xf32>
    %cst_46 = arith.constant dense<0.000000e+00> : vector<16xf32>
    %169 = vector.multi_reduction <add>, %168, %cst_46 [1] : vector<16x324xf32> to vector<16xf32>
    %170 = vector.shape_cast %169 : vector<16xf32> to vector<16x1xf32>
    %cst_47 = arith.constant 3.906250e-03 : f32
    %171 = vector.broadcast %cst_47 : f32 to vector<16x1xf32>
    %172 = arith.mulf %170, %171 : vector<16x1xf32>
    %173 = vector.broadcast %172 : vector<16x1xf32> to vector<16x8xf32>
    %174 = arith.mulf %3, %173 : vector<16x8xf32>
    %cst_48 = arith.constant dense<0.000000e+00> : vector<8xf32>
    %175 = vector.multi_reduction <add>, %174, %cst_48 [0] : vector<16x8xf32> to vector<8xf32>
    %176 = vector.shape_cast %175 : vector<8xf32> to vector<1x8xf32>
    %177 = arith.addf %176, %4 : vector<1x8xf32>
    %cst_49 = arith.constant 0.000000e+00 : f32
    %178 = vector.broadcast %cst_49 : f32 to vector<1x8xf32>
    %179 = arith.maximumf %177, %178 : vector<1x8xf32>
    %180 = vector.broadcast %179 : vector<1x8xf32> to vector<16x8xf32>
    %181 = arith.mulf %5, %180 : vector<16x8xf32>
    %cst_50 = arith.constant dense<0.000000e+00> : vector<16xf32>
    %182 = vector.multi_reduction <add>, %181, %cst_50 [1] : vector<16x8xf32> to vector<16xf32>
    %183 = vector.shape_cast %182 : vector<16xf32> to vector<16x1xf32>
    %184 = arith.addf %183, %6 : vector<16x1xf32>
    %cst_51 = arith.constant 3.000000e+00 : f32
    %185 = vector.broadcast %cst_51 : f32 to vector<16x1xf32>
    %186 = arith.addf %184, %185 : vector<16x1xf32>
    %cst_52 = arith.constant 0.000000e+00 : f32
    %cst_53 = arith.constant 6.000000e+00 : f32
    %187 = vector.broadcast %cst_52 : f32 to vector<16x1xf32>
    %188 = arith.maximumf %187, %186 : vector<16x1xf32>
    %189 = vector.broadcast %cst_53 : f32 to vector<16x1xf32>
    %190 = arith.minimumf %189, %188 : vector<16x1xf32>
    %cst_54 = arith.constant 0.166666672 : f32
    %191 = vector.broadcast %cst_54 : f32 to vector<16x1xf32>
    %192 = arith.mulf %190, %191 : vector<16x1xf32>
    %193 = vector.broadcast %192 : vector<16x1xf32> to vector<16x324xf32>
    %194 = arith.mulf %166, %193 : vector<16x324xf32>
    %195 = arith.truncf %194 : vector<16x324xf32> to vector<16x324xbf16>
    %cst_55 = arith.constant dense<0.000000e+00> : vector<32x324xf32>
    %196 = tpu.matmul %7, %195, %cst_55 {dimension_numbers = #tpu.dot_dimension_numbers<[1], [0], [0], [1], [0, 0, 1, 1], [], []>} : vector<32x16xbf16>, vector<16x324xbf16>, vector<32x324xf32> -> vector<32x324xf32>
    %197 = vector.broadcast %8 : vector<32x1xf32> to vector<32x324xf32>
    %198 = arith.addf %196, %197 : vector<32x324xf32>
    %cst_56 = arith.constant 3.000000e+00 : f32
    %199 = vector.broadcast %cst_56 : f32 to vector<32x324xf32>
    %200 = arith.addf %198, %199 : vector<32x324xf32>
    %cst_57 = arith.constant 0.000000e+00 : f32
    %cst_58 = arith.constant 6.000000e+00 : f32
    %201 = vector.broadcast %cst_57 : f32 to vector<32x324xf32>
    %202 = arith.maximumf %201, %200 : vector<32x324xf32>
    %203 = vector.broadcast %cst_58 : f32 to vector<32x324xf32>
    %204 = arith.minimumf %203, %202 : vector<32x324xf32>
    %cst_59 = arith.constant 0.166666672 : f32
    %205 = vector.broadcast %cst_59 : f32 to vector<32x324xf32>
    %206 = arith.mulf %204, %205 : vector<32x324xf32>
    %207 = arith.mulf %198, %206 : vector<32x324xf32>
    %c1_60 = arith.constant 1 : index
    %c0_61 = arith.constant 0 : index
    %c0_62 = arith.constant 0 : index
    %208 = vector.load %arg11[%c1_60, %c0_61, %c0_62] : memref<2x32x324xf32, #tpu.memory_space<vmem>>, vector<1x32x324xf32>
    %209 = vector.shape_cast %208 : vector<1x32x324xf32> to vector<32x324xf32>
    %210 = vector.shape_cast %207 : vector<32x324xf32> to vector<1x32x324xf32>
    tpu.vector_store %arg11[%c1_60, %c0_61, %c0_62], %210 {strides = array<i32>} : memref<2x32x324xf32, #tpu.memory_space<vmem>>, vector<1x32x324xf32>,
    return
  }
  func.func @transform_0(%arg0: i32) -> (i32, i32, i32) {
    %c0_i32 = arith.constant 0 : i32
    %c0_i32_0 = arith.constant 0 : i32
    %c0_i32_1 = arith.constant 0 : i32
    return %arg0, %c0_i32, %c0_i32_0 : i32, i32, i32
  }
  func.func @transform_1(%arg0: i32) -> (i32, i32) {
    %c0_i32 = arith.constant 0 : i32
    %c0_i32_0 = arith.constant 0 : i32
    %c0_i32_1 = arith.constant 0 : i32
    return %c0_i32, %c0_i32_0 : i32, i32
  }
  func.func @transform_2(%arg0: i32) -> (i32, i32) {
    %c0_i32 = arith.constant 0 : i32
    %c0_i32_0 = arith.constant 0 : i32
    %c0_i32_1 = arith.constant 0 : i32
    return %c0_i32, %c0_i32_0 : i32, i32
  }
  func.func @transform_3(%arg0: i32) -> (i32, i32) {
    %c0_i32 = arith.constant 0 : i32
    %c0_i32_0 = arith.constant 0 : i32
    %c0_i32_1 = arith.constant 0 : i32
    return %c0_i32, %c0_i32_0 : i32, i32
  }
  func.func @transform_4(%arg0: i32) -> (i32, i32) {
    %c0_i32 = arith.constant 0 : i32
    %c0_i32_0 = arith.constant 0 : i32
    %c0_i32_1 = arith.constant 0 : i32
    return %c0_i32, %c0_i32_0 : i32, i32
  }
  func.func @transform_5(%arg0: i32) -> (i32, i32) {
    %c0_i32 = arith.constant 0 : i32
    %c0_i32_0 = arith.constant 0 : i32
    %c0_i32_1 = arith.constant 0 : i32
    return %c0_i32, %c0_i32_0 : i32, i32
  }
  func.func @transform_6(%arg0: i32) -> (i32, i32) {
    %c0_i32 = arith.constant 0 : i32
    %c0_i32_0 = arith.constant 0 : i32
    %c0_i32_1 = arith.constant 0 : i32
    return %c0_i32, %c0_i32_0 : i32, i32
  }
  func.func @transform_7(%arg0: i32) -> (i32, i32) {
    %c0_i32 = arith.constant 0 : i32
    %c0_i32_0 = arith.constant 0 : i32
    %c0_i32_1 = arith.constant 0 : i32
    return %c0_i32, %c0_i32_0 : i32, i32
  }
  func.func @transform_8(%arg0: i32) -> (i32, i32) {
    %c0_i32 = arith.constant 0 : i32
    %c0_i32_0 = arith.constant 0 : i32
    %c0_i32_1 = arith.constant 0 : i32
    return %c0_i32, %c0_i32_0 : i32, i32
  }
  func.func @transform_9(%arg0: i32) -> (i32, i32) {
    %c0_i32 = arith.constant 0 : i32
    %c0_i32_0 = arith.constant 0 : i32
    %c0_i32_1 = arith.constant 0 : i32
    return %c0_i32, %c0_i32_0 : i32, i32
  }
  func.func @transform_10(%arg0: i32) -> (i32, i32, i32) {
    %c0_i32 = arith.constant 0 : i32
    %c0_i32_0 = arith.constant 0 : i32
    %c0_i32_1 = arith.constant 0 : i32
    return %arg0, %c0_i32, %c0_i32_0 : i32, i32, i32
  }
}

</mosaic_0001>

<bundles_post_ra>
// kernel: squeeze.4
= control target key start
LH: loop header
LB: loop body
LE: loop exit
PB: predicated region body
PF: predicated region fallthrough
CT: control target
= control target key end

     0   :  { %vm16_vm0 = vcmask 130048   ;;  %s61_s0 = inlined_call_operand.vmem [shape: f32[16,3,3], index: 0, kind: input, shape index: {}]   ;;  %s62_s1 = inlined_call_operand.vmem [shape: f32[16,9], index: 1, kind: output, shape index: {}]  }
   0x1   :  { %v29_v0 = vld [vmem:[%s61_s0 + $0x8] sm:$0xf]  ;;  %v30_v1 = vld [vmem:[%s61_s0 + $0x4] sm:$0xf]  ;;  %v13_v2 = vld [vmem:[%s61_s0] sm:$0xf] }
   0x2   :  { %8 = vst [vmem:[#allocation0 + $0x10] sm:$0xf] %v29_v0  ;;  %12 = vst [vmem:[#allocation0 + $0x8] sm:$0xf] %v30_v1 }
   0x3   :  { %14 = vst [vmem:[#allocation0] sm:$0xf] %v13_v2 }
   0x9   :  { %v19_v4 = vld [vmem:[#allocation0 + $0x8] sm:$0x7]   ;;  %v24_v5 = vld [vmem:[#allocation0 + $0x10] sm:$0x7]  }
   0xa   :  { %v15_v3 = vld [vmem:[#allocation0] sm:$0x7]   ;;  %31 = vst.msk [vmem:[%s62_s1 + $0x3] sm:$0x7] %vm16_vm0, %v19_v4   ;;  %32 = vst.msk [vmem:[%s62_s1 + $0x6] sm:$0x7] %vm16_vm0, %v24_v5  }
   0xb   :  { %17 = vst.msk [vmem:[%s62_s1] sm:$0x7] %vm16_vm0, %v15_v3  }

// kernel: dep_sep_conv_pallas.1
= control target key start
LH: loop header
LB: loop body
LE: loop exit
PB: predicated region body
PF: predicated region fallthrough
CT: control target
= control target key end

     0   :  { %s2004_s13 = smov 0   ;;  %s2761_s0 = inlined_call_operand.vmem [shape: f32[8,16,362], index: 0, kind: input, shape index: {}]   ;;  %s2762_s1 = inlined_call_operand.vmem [shape: f32[16,9], index: 1, kind: input, shape index: {}]   ;;  %s2763_s2 = inlined_call_operand.vmem [shape: f32[16,1], index: 2, kind: input, shape index: {}]   ;;  %s2764_s3 = inlined_call_operand.vmem [shape: f32[1,324], index: 3, kind: input, shape index: {}]   ;;  %s2765_s4 = inlined_call_operand.vmem [shape: f32[16,8], index: 4, kind: input, shape index: {}]   ;;  %s2766_s5 = inlined_call_operand.vmem [shape: f32[1,8], index: 5, kind: input, shape index: {}]   ;;  %s2767_s6 = inlined_call_operand.vmem [shape: f32[16,8], index: 6, kind: input, shape index: {}]   ;;  %s2768_s7 = inlined_call_operand.vmem [shape: f32[16,1], index: 7, kind: input, shape index: {}]   ;;  %s2769_s8 = inlined_call_operand.vmem [shape: bf16[32,16], index: 8, kind: input, shape index: {}]   ;;  %s2770_s9 = inlined_call_operand.vmem [shape: f32[32,1], index: 9, kind: input, shape index: {}]   ;;  %s2771_s10 = inlined_call_operand.vmem [shape: f32[8,32,324], index: 10, kind: output, shape index: {}]  }
   0x1 LB: > { %s1824_s14 = sadd.s32 4294967295, %s1930_s13   ;;  %p1828_p0 = scmp.ge.s32.totalorder %s1930_s13, 1  ;;  %s1930_s13 = sphi %s2004_s13, %s20_s13  }
   0x2   : > { %p314_p1 = scmp.lt.s32.totalorder %s1930_s13, 5 }
   0x4   : > { %p315_p2 = pnand %p1828_p0, %p314_p1 }
   0x5   : > { %v369_v0 = vld [vmem:[%s2762_s1] sm:$0xff] (!%p315_p2)  ;;  %v1932_v1 = vmov (!%p315_p2), 1   ;;  %v1933_v2 = vmov (!%p315_p2), 2   ;;  %v370_v3 = vld [vmem:[%s2762_s1 + $0x8] sm:$0xff] (!%p315_p2)  ;;  %v1934_v4 = vmov (!%p315_p2), 0   ;;  %v1935_v5 = vmov (!%p315_p2), 3  }
   0x6   : > { %318 = sbr.rel (%p315_p2) target bundleno = 1159 (0x487), region = 60  ;;  %1908 = vset.pattern.permute.xlu0 (!%p315_p2), %v1932_v1  ;;  %1909 = vset.pattern.permute.xlu1 (!%p315_p2), %v1933_v2  ;;  %v1936_v6 = vmov (!%p315_p2), 4   ;;  %v1937_v7 = vmov (!%p315_p2), 5   ;;  %v1938_v8 = vmov (!%p315_p2), 6   ;;  %v1939_v9 = vmov (!%p315_p2), 7   ;;  %v372_v10 = vld [vmem:[%s2763_s2 + $0x8] sm:$0xff] (!%p315_p2) }
   0x7   : > { %412 = vperm.xlu0 (!%p315_p2), %1908, %v369_v0   ;;  %461 = vperm.xlu1 (!%p315_p2), %1909, %v369_v0   ;;  %v1940_v11 = vmov (!%p315_p2), 8   ;;  %v371_v12 = vld [vmem:[%s2763_s2] sm:$0xff] (!%p315_p2)  ;;  %s1829_s23 = sshll.u32 (!%p315_p2), %s1824_s14, 1  ;;  %s1941_s28 = smov (!%p315_p2), 127   ;;  %vm443_vm0 = vcmask (!%p315_p2), 1039360   ;;  %vm492_vm1 = vcmask (!%p315_p2), 1031168  }
   0x8   : > { %1008 = vmatprep.mubr.bf16.mxu0 (!%p315_p2), %v1934_v4  ;;  %p355_p3 = scmp.lt.s32.totalorder (!%p315_p2), %s1829_s23, 7  ;;  %s1942_s29 = smov (!%p315_p2), 126   ;;  %vm541_vm2 = vcmask (!%p315_p2), 900096   ;;  %vm590_vm3 = vcmask (!%p315_p2), 891904   ;;  %vm639_vm4 = vcmask (!%p315_p2), 883712   ;;  %vm688_vm5 = vcmask (!%p315_p2), 752640  }
   0x9   : > { %s1943_s30 = smov (!%p315_p2), 110   ;;  %s1944_s11 = smov (!%p315_p2), 109   ;;  %vm737_vm6 = vcmask (!%p315_p2), 744448   ;;  %vm786_vm7 = vcmask (!%p315_p2), 736256   ;;  %vm872_vm8 = vcmask (!%p315_p2), 556032   ;;  %vm886_vm9 = vcmask (!%p315_p2), 64512  }
   0xa   : > { %s1945_s12 = smov (!%p315_p2), 108   ;;  %s1946_s14 = smov (!%p315_p2), 92   ;;  %vm969_vm10 = vcmask (!%p315_p2), 130048  }
   0xb   : > { %416 = vperm.xlu0 (!%p315_p2), %1908, %v370_v3   ;;  %465 = vperm.xlu1 (!%p315_p2), %1909, %v370_v3   ;;  %s1947_s15 = smov (!%p315_p2), 91   ;;  %s1948_s16 = smov (!%p315_p2), 90  }
   0xd   : > { %s2773_s23 = smov (!%p355_p3, %s1829_s23), 7 }
   0xe   : > { %s1881_s24 = smul.u32 48, %s2773_s23 }
   0xf   : > { %1910 = vset.pattern.permute.xlu0 %v1935_v5  ;;  %1911 = vset.pattern.permute.xlu1 %v1935_v5 }
  0x10   : > { %510 = vperm.xlu0 %1910, %v369_v0   ;;  %514 = vperm.xlu1 %1911, %v370_v3   ;;  %s2035_s27 = scalar_lea.vmem %s2761_s0, %s1881_s24 }
  0x11   : > { %v2038_v13 = vld [vmem:[%s2035_s27 + $0x8] sm:$0xff]  ;;  %v2041_v14 = vld [vmem:[%s2035_s27] sm:$0xff]  ;;  %v2050_v18 = vld [vmem:[%s2035_s27 + $0x18] sm:$0xff] }
  0x12   : > { %v2053_v19 = vld [vmem:[%s2035_s27 + $0x10] sm:$0xff]  ;;  %v2064_v23 = vld [vmem:[%s2035_s27 + $0x28] sm:$0xff]  ;;  %v2067_v24 = vld [vmem:[%s2035_s27 + $0x20] sm:$0xff] }
  0x13   : > { %v2164_v59 = vld [vmem:[%s2035_s27 + $0x38] sm:$0xff]  ;;  %v2167_v60 = vld [vmem:[%s2035_s27 + $0x30] sm:$0xff]  ;;  %v2176_v63 = vld [vmem:[%s2035_s27 + $0x48] sm:$0xff] }
  0x14   : > { %1912 = vset.pattern.permute.xlu1 %v1936_v6  ;;  %1913 = vset.pattern.permute.xlu0 %v1936_v6  ;;  %v2191_v5 = vld [vmem:[%s2035_s27 + $0x50] sm:$0xff] }
  0x15   : > { %559 = vperm.xlu1 %1912, %v369_v0   ;;  %563 = vperm.xlu0 %1913, %v370_v3  }
  0x19   : > { %1914 = vset.pattern.permute.xlu1 %v1937_v7  ;;  %1915 = vset.pattern.permute.xlu0 %v1938_v8 }
  0x1a   : > { %608 = vperm.xlu1 %1914, %v369_v0   ;;  %657 = vperm.xlu0 %1915, %v369_v0  }
  0x1e   : > { %612 = vperm.xlu1 %1914, %v370_v3   ;;  %1918 = vset.pattern.permute.xlu0 %v1939_v9 }
  0x1f   : > { %710 = vperm.xlu0 %1918, %v370_v3  }
  0x22   : > { %1916 = vset.pattern.permute.xlu1 %v1938_v8 }
  0x23   : > { %661 = vperm.xlu1 %1916, %v370_v3   ;;  %1920 = vset.pattern.permute.xlu0 %v1934_v4 }
  0x24   : > { %397 = vperm.xlu0 %1920, %v369_v0  }
  0x27   : > { %1917 = vset.pattern.permute.xlu1 %v1939_v9 }
  0x28   : > { %706 = vperm.xlu1 %1917, %v369_v0   ;;  %810 = vperm.xlu0 %1920, %v372_v10  }
  0x2c   : > { %1919 = vset.pattern.permute.xlu1 %v1940_v11 }
  0x2d   : > { %755 = vperm.xlu1 %1919, %v369_v0   ;;  %v2179_v0 = vld [vmem:[%s2035_s27 + $0x40] sm:$0xff] }
  0x31   : > { %759 = vperm.xlu1 %1919, %v370_v3  }
  0x35   : > { %1921 = vset.pattern.permute.xlu1 %v1934_v4 }
  0x36   : > { %402 = vperm.xlu1 %1921, %v370_v3   ;;  %v2188_v3 = vld [vmem:[%s2035_s27 + $0x58] sm:$0xff] }
  0x3a   : > { %805 = vperm.xlu1 %1921, %v371_v12  }
  0x86   : > { %v2043_v15 = vpop.permute.xlu0 %412  ;;  %v2071_v25 = vpop.permute.xlu1 %461 }
  0x87   : > { %v420_v16 = vmul.f32 %v2043_v15, %v2038_v13  ;;  %v419_v17 = vmul.f32 %v2043_v15, %v2041_v14  ;;  %v421_v22 = vmul.f32 %v2043_v15, %v2053_v19  ;;  %v469_v28 = vmul.f32 %v2071_v25, %v2038_v13 }
  0x88   : > { %v468_v29 = vmul.f32 %v2071_v25, %v2041_v14  ;;  %v470_v32 = vmul.f32 %v2071_v25, %v2053_v19  ;;  %v1164_v61 = vmul.f32 %v2164_v59, %v2043_v15  ;;  %v1163_v62 = vmul.f32 %v2167_v60, %v2043_v15 }
  0x89   : > { %433 = vrot.lane.b32.xlu0 %v420_v16, %s1941_s28  ;;  %431 = vrot.lane.b32.xlu1 %v419_v17, %s1941_s28  ;;  %v1165_v2 = vmul.f32 %v2179_v0, %v2043_v15 }
  0x8a   : > { %v2057_v20 = vpop.permute.xlu0 %416  ;;  %v2083_v30 = vpop.permute.xlu1 %465 }
  0x8b   : > { %v422_v21 = vmul.f32 %v2057_v20, %v2050_v18  ;;  %v424_v26 = vmul.f32 %v2057_v20, %v2064_v23  ;;  %v423_v27 = vmul.f32 %v2057_v20, %v2067_v24  ;;  %v471_v31 = vmul.f32 %v2083_v30, %v2050_v18 }
  0x8c   : > { %v473_v34 = vmul.f32 %v2083_v30, %v2064_v23  ;;  %v472_v35 = vmul.f32 %v2083_v30, %v2067_v24  ;;  %v1166_v1 = vmul.f32 %v2176_v63, %v2057_v20  ;;  %v1168_v7 = vmul.f32 %v2188_v3, %v2057_v20 }
  0x8d   : > { %437 = vrot.lane.b32.xlu0 %v422_v21, %s1941_s28  ;;  %435 = vrot.lane.b32.xlu1 %v421_v22, %s1941_s28  ;;  %v1167_v8 = vmul.f32 %v2191_v5, %v2057_v20  ;;  %v1204_v20 = vmul.f32 %v2164_v59, %v2071_v25  ;;  %v1203_v21 = vmul.f32 %v2167_v60, %v2071_v25 }
  0x8e   : > { %v1206_v22 = vmul.f32 %v2176_v63, %v2083_v30 }
  0x8f   : > { %v2093_v33 = vpop.permute.xlu0 %510  ;;  %v2105_v38 = vpop.permute.xlu1 %514 }
  0x90   : > { %v518_v36 = vmul.f32 %v2093_v33, %v2038_v13  ;;  %v517_v37 = vmul.f32 %v2093_v33, %v2041_v14  ;;  %v520_v39 = vmul.f32 %v2105_v38, %v2050_v18  ;;  %v519_v40 = vmul.f32 %v2093_v33, %v2053_v19 }
  0x91   : > { %441 = vrot.lane.b32.xlu0 %v424_v26, %s1941_s28  ;;  %439 = vrot.lane.b32.xlu1 %v423_v27, %s1941_s28  ;;  %v522_v42 = vmul.f32 %v2105_v38, %v2064_v23  ;;  %v521_v43 = vmul.f32 %v2105_v38, %v2067_v24  ;;  %v1205_v26 = vmul.f32 %v2179_v0, %v2071_v25 }
  0x94   : > { %v2115_v41 = vpop.permute.xlu1 %559  ;;  %v2127_v46 = vpop.permute.xlu0 %563 }
  0x95   : > { %482 = vrot.lane.b32.xlu0 %v469_v28, %s1942_s29  ;;  %480 = vrot.lane.b32.xlu1 %v468_v29, %s1942_s29  ;;  %v567_v44 = vmul.f32 %v2115_v41, %v2038_v13  ;;  %v566_v45 = vmul.f32 %v2115_v41, %v2041_v14  ;;  %v569_v47 = vmul.f32 %v2127_v46, %v2050_v18 }
  0x96   : > { %v568_v48 = vmul.f32 %v2115_v41, %v2053_v19  ;;  %v571_v50 = vmul.f32 %v2127_v46, %v2064_v23  ;;  %v570_v51 = vmul.f32 %v2127_v46, %v2067_v24  ;;  %v1208_v28 = vmul.f32 %v2188_v3, %v2083_v30 }
  0x97   : > { %v1207_v29 = vmul.f32 %v2191_v5, %v2083_v30 }
  0x99   : > { %486 = vrot.lane.b32.xlu0 %v471_v31, %s1942_s29  ;;  %484 = vrot.lane.b32.xlu1 %v470_v32, %s1942_s29  ;;  %v2137_v49 = vpop.permute.xlu1 %608  ;;  %v2195_v6 = vpop.permute.xlu0 %657 }
  0x9a   : > { %v616_v52 = vmul.f32 %v2137_v49, %v2038_v13  ;;  %v615_v53 = vmul.f32 %v2137_v49, %v2041_v14  ;;  %v617_v56 = vmul.f32 %v2137_v49, %v2053_v19  ;;  %v665_v9 = vmul.f32 %v2195_v6, %v2038_v13 }
  0x9b   : > { %v664_v10 = vmul.f32 %v2195_v6, %v2041_v14  ;;  %v666_v15 = vmul.f32 %v2195_v6, %v2053_v19 }
  0x9d   : > { %490 = vrot.lane.b32.xlu0 %v473_v34, %s1942_s29  ;;  %488 = vrot.lane.b32.xlu1 %v472_v35, %s1942_s29  ;;  %v2149_v54 = vpop.permute.xlu1 %612 }
  0x9e   : > { %v618_v55 = vmul.f32 %v2149_v54, %v2050_v18  ;;  %v620_v57 = vmul.f32 %v2149_v54, %v2064_v23  ;;  %v619_v58 = vmul.f32 %v2149_v54, %v2067_v24  ;;  %v2249_v34 = vpop.permute.xlu0 %710 }
  0x9f   : > { %v716_v30 = vmul.f32 %v2249_v34, %v2050_v18 }
  0xa1   : > { %531 = vrot.lane.b32.xlu0 %v518_v36, %s1943_s30  ;;  %529 = vrot.lane.b32.xlu1 %v517_v37, %s1943_s30  ;;  %v718_v37 = vmul.f32 %v2249_v34, %v2064_v23 }
  0xa2   : > { %v2207_v11 = vpop.permute.xlu1 %661 }
  0xa3   : > { %v667_v12 = vmul.f32 %v2207_v11, %v2050_v18  ;;  %v669_v16 = vmul.f32 %v2207_v11, %v2064_v23  ;;  %v668_v17 = vmul.f32 %v2207_v11, %v2067_v24 }
  0xa5   : > { %535 = vrot.lane.b32.xlu0 %v520_v39, %s1943_s30  ;;  %533 = vrot.lane.b32.xlu1 %v519_v40, %s1943_s30  ;;  %v717_v39 = vmul.f32 %v2249_v34, %v2067_v24 }
  0xa7   : > { %v2233_v27 = vpop.permute.xlu1 %706 }
  0xa8   : > { %v714_v25 = vmul.f32 %v2233_v27, %v2038_v13  ;;  %v713_v32 = vmul.f32 %v2233_v27, %v2041_v14  ;;  %v715_v36 = vmul.f32 %v2233_v27, %v2053_v19 }
  0xa9   : > { %539 = vrot.lane.b32.xlu0 %v522_v42, %s1943_s30  ;;  %537 = vrot.lane.b32.xlu1 %v521_v43, %s1943_s30  ;;  %v2267_v42 = vpop.permute.xlu0 %397  ;;  %v1244_v43 = vmul.f32 %v2164_v59, %v2093_v33 }
  0xac   : > { %v2243_v31 = vpop.permute.xlu1 %755 }
  0xad   : > { %580 = vrot.lane.b32.xlu0 %v567_v44, %s1944_s11  ;;  %578 = vrot.lane.b32.xlu1 %v566_v45, %s1944_s11  ;;  %v1243_v44 = vmul.f32 %v2167_v60, %v2093_v33 }
  0xb0   : > { %v2255_v35 = vpop.permute.xlu1 %759 }
  0xb1   : > { %584 = vrot.lane.b32.xlu0 %v569_v47, %s1944_s11  ;;  %582 = vrot.lane.b32.xlu1 %v568_v48, %s1944_s11  ;;  %v2279_v47 = vpop.permute.xlu0 %810  ;;  %v1246_v48 = vmul.f32 %v2176_v63, %v2105_v38 }
  0xb5   : > { %588 = vrot.lane.b32.xlu0 %v571_v50, %s1944_s11  ;;  %586 = vrot.lane.b32.xlu1 %v570_v51, %s1944_s11  ;;  %v2265_v40 = vpop.permute.xlu1 %402  ;;  %v1245_v50 = vmul.f32 %v2179_v0, %v2093_v33  ;;  %v763_v33 = vmul.f32 %v2243_v31, %v2038_v13 }
  0xb9   : > { %629 = vrot.lane.b32.xlu0 %v616_v52, %s1945_s12  ;;  %627 = vrot.lane.b32.xlu1 %v615_v53, %s1945_s12  ;;  %v2277_v45 = vpop.permute.xlu1 %805  ;;  %v1248_v53 = vmul.f32 %v2188_v3, %v2105_v38 }
  0xbd   : > { %633 = vrot.lane.b32.xlu0 %v618_v55, %s1945_s12  ;;  %631 = vrot.lane.b32.xlu1 %v617_v56, %s1945_s12  ;;  %v1247_v55 = vmul.f32 %v2191_v5, %v2105_v38  ;;  %v765_v38 = vmul.f32 %v2255_v35, %v2050_v18 }
  0xc1   : > { %637 = vrot.lane.b32.xlu0 %v620_v57, %s1945_s12  ;;  %635 = vrot.lane.b32.xlu1 %v619_v58, %s1945_s12  ;;  %v762_v58 = vmul.f32 %v2243_v31, %v2041_v14 }
  0xc5   : > { %1177 = vrot.lane.b32.xlu0 %v1164_v61, %s1941_s28  ;;  %1175 = vrot.lane.b32.xlu1 %v1163_v62, %s1941_s28 }
  0xc9   : > { %1181 = vrot.lane.b32.xlu0 %v1166_v1, %s1941_s28  ;;  %1179 = vrot.lane.b32.xlu1 %v1165_v2, %s1941_s28  ;;  %v764_v1 = vmul.f32 %v2243_v31, %v2053_v19 }
  0xcd   : > { %1185 = vrot.lane.b32.xlu0 %v1168_v7, %s1941_s28  ;;  %1183 = vrot.lane.b32.xlu1 %v1167_v8, %s1941_s28  ;;  %v767_v8 = vmul.f32 %v2255_v35, %v2064_v23  ;;  %s1882_s28 = smul.u32 96, %s2773_s23 }
  0xcf   : > { %s2708_s23 = scalar_lea.vmem %s2771_s10, %s1882_s28 }
  0xd1   : > { %678 = vrot.lane.b32.xlu0 %v665_v9, %s1946_s14  ;;  %676 = vrot.lane.b32.xlu1 %v664_v10, %s1946_s14  ;;  %v766_v9 = vmul.f32 %v2255_v35, %v2067_v24 }
  0xd5   : > { %682 = vrot.lane.b32.xlu0 %v667_v12, %s1946_s14  ;;  %680 = vrot.lane.b32.xlu1 %v666_v15, %s1946_s14  ;;  %v1284_v15 = vmul.f32 %v2164_v59, %v2115_v41 }
  0xd9   : > { %686 = vrot.lane.b32.xlu0 %v669_v16, %s1946_s14  ;;  %684 = vrot.lane.b32.xlu1 %v668_v17, %s1946_s14  ;;  %v1283_v16 = vmul.f32 %v2167_v60, %v2115_v41 }
  0xdd   : > { %1217 = vrot.lane.b32.xlu0 %v1204_v20, %s1942_s29  ;;  %1215 = vrot.lane.b32.xlu1 %v1203_v21, %s1942_s29  ;;  %v1286_v21 = vmul.f32 %v2176_v63, %v2127_v46 }
  0xe1   : > { %1221 = vrot.lane.b32.xlu0 %v1206_v22, %s1942_s29  ;;  %1219 = vrot.lane.b32.xlu1 %v1205_v26, %s1942_s29  ;;  %v1285_v22 = vmul.f32 %v2179_v0, %v2115_v41  ;;  %v407_v26 = vmul.f32 %v2267_v42, %v2053_v19  ;;  %v1287_v41 = vmul.f32 %v2191_v5, %v2127_v46 }
  0xe2   : > { %v1324_v19 = vmul.f32 %v2164_v59, %v2137_v49 }
  0xe5   : > { %1225 = vrot.lane.b32.xlu0 %v1208_v28, %s1942_s29  ;;  %1223 = vrot.lane.b32.xlu1 %v1207_v29, %s1942_s29  ;;  %v406_v29 = vmul.f32 %v2267_v42, %v2038_v13  ;;  %v405_v13 = vmul.f32 %v2267_v42, %v2041_v14 }
  0xe9   : > { %727 = vrot.lane.b32.xlu0 %v714_v25, %s1947_s15  ;;  %725 = vrot.lane.b32.xlu1 %v713_v32, %s1947_s15 }
  0xed   : > { %731 = vrot.lane.b32.xlu0 %v716_v30, %s1947_s15  ;;  %729 = vrot.lane.b32.xlu1 %v715_v36, %s1947_s15  ;;  %v1288_v30 = vmul.f32 %v2188_v3, %v2127_v46  ;;  %v408_v46 = vmul.f32 %v2265_v40, %v2050_v18 }
  0xf1   : > { %735 = vrot.lane.b32.xlu0 %v718_v37, %s1947_s15  ;;  %733 = vrot.lane.b32.xlu1 %v717_v39, %s1947_s15  ;;  %v1323_v39 = vmul.f32 %v2167_v60, %v2137_v49 }
  0xf5   : > { %1257 = vrot.lane.b32.xlu0 %v1244_v43, %s1943_s30  ;;  %1255 = vrot.lane.b32.xlu1 %v1243_v44, %s1943_s30  ;;  %v410_v44 = vmul.f32 %v2265_v40, %v2064_v23 }
  0xf9   : > { %1261 = vrot.lane.b32.xlu0 %v1246_v48, %s1943_s30  ;;  %1259 = vrot.lane.b32.xlu1 %v1245_v50, %s1943_s30 }
  0xfb   : > { %v434_v51 = vpop.permute.xlu0 %433  ;;  %v432_v52 = vpop.permute.xlu1 %431 }
  0xfd   : > { %1265 = vrot.lane.b32.xlu0 %v1248_v53, %s1943_s30  ;;  %1263 = vrot.lane.b32.xlu1 %v1247_v55, %s1943_s30  ;;  %v444_v55 = vsel %vm443_vm0, %v432_v52, %v434_v51  ;;  %v1325_v52 = vmul.f32 %v2179_v0, %v2137_v49 }
  0xff   : > { %v438_v56 = vpop.permute.xlu0 %437  ;;  %v436_v57 = vpop.permute.xlu1 %435 }
 0x100   : > { %v445_v28 = vsel %vm443_vm0, %v434_v51, %v436_v57  ;;  %v456_v36 = vadd.f32 %v436_v57, %v407_v26  ;;  %v409_v57 = vmul.f32 %v2265_v40, %v2067_v24 }
 0x101   : > { %776 = vrot.lane.b32.xlu0 %v763_v33, %s1948_s16  ;;  %774 = vrot.lane.b32.xlu1 %v762_v58, %s1948_s16  ;;  %v455_v43 = vadd.f32 %v445_v28, %v406_v29 }
 0x103   : > { %v442_v61 = vpop.permute.xlu0 %441  ;;  %v440_v62 = vpop.permute.xlu1 %439 }
 0x104   : > { %v446_v48 = vsel %vm443_vm0, %v438_v56, %v440_v62  ;;  %v447_v50 = vsel %vm443_vm0, %v440_v62, %v442_v61  ;;  %v459_v14 = vadd.f32 %v442_v61, %v410_v44  ;;  %v454_v61 = vadd.f32 %v444_v55, %v405_v13 }
 0x105   : > { %780 = vrot.lane.b32.xlu0 %v765_v38, %s1948_s16  ;;  %778 = vrot.lane.b32.xlu1 %v764_v1, %s1948_s16  ;;  %v457_v56 = vadd.f32 %v446_v48, %v408_v46  ;;  %v1363_v13 = vmul.f32 %v2167_v60, %v2195_v6 }
 0x107   : > { %v483_v2 = vpop.permute.xlu0 %482  ;;  %v481_v7 = vpop.permute.xlu1 %480 }
 0x108   : > { %v493_v51 = vsel %vm492_vm1, %v481_v7, %v483_v2 }
 0x109   : > { %784 = vrot.lane.b32.xlu0 %v767_v8, %s1948_s16  ;;  %782 = vrot.lane.b32.xlu1 %v766_v9, %s1948_s16  ;;  %v458_v9 = vadd.f32 %v447_v50, %v409_v57  ;;  %v1366_v50 = vmul.f32 %v2176_v63, %v2207_v11 }
 0x10b   : > { %v487_v10 = vpop.permute.xlu0 %486  ;;  %v485_v12 = vpop.permute.xlu1 %484 }
 0x10c   : > { %v494_v37 = vsel %vm492_vm1, %v483_v2, %v485_v12  ;;  %v505_v53 = vadd.f32 %v485_v12, %v456_v36  ;;  %v503_v2 = vadd.f32 %v493_v51, %v454_v61  ;;  %v1403_v51 = vmul.f32 %v2167_v60, %v2233_v27 }
 0x10d   : > { %1297 = vrot.lane.b32.xlu0 %v1284_v15, %s1944_s11  ;;  %1295 = vrot.lane.b32.xlu1 %v1283_v16, %s1944_s11  ;;  %v504_v23 = vadd.f32 %v494_v37, %v455_v43 }
 0x10f   : > { %v491_v17 = vpop.permute.xlu0 %490  ;;  %v489_v20 = vpop.permute.xlu1 %488 }
 0x110   : > { %v495_v38 = vsel %vm492_vm1, %v487_v10, %v489_v20  ;;  %v496_v1 = vsel %vm492_vm1, %v489_v20, %v491_v17  ;;  %v508_v24 = vadd.f32 %v491_v17, %v459_v14  ;;  %v1326_v20 = vmul.f32 %v2176_v63, %v2149_v54 }
 0x111   : > { %1301 = vrot.lane.b32.xlu0 %v1286_v21, %s1944_s11  ;;  %1299 = vrot.lane.b32.xlu1 %v1285_v22, %s1944_s11  ;;  %v506_v10 = vadd.f32 %v495_v38, %v457_v56  ;;  %v507_v12 = vadd.f32 %v496_v1, %v458_v9  ;;  %v1368_v1 = vmul.f32 %v2188_v3, %v2207_v11 }
 0x113   : > { %v532_v25 = vpop.permute.xlu0 %531  ;;  %v530_v32 = vpop.permute.xlu1 %529 }
 0x114   : > { %v542_v21 = vsel %vm541_vm2, %v530_v32, %v532_v25 }
 0x115   : > { %1305 = vrot.lane.b32.xlu0 %v1288_v30, %s1944_s11  ;;  %1303 = vrot.lane.b32.xlu1 %v1287_v41, %s1944_s11  ;;  %v552_v49 = vadd.f32 %v542_v21, %v503_v2  ;;  %v1328_v41 = vmul.f32 %v2188_v3, %v2149_v54  ;;  %v1157_v2 = vmul.f32 %v2167_v60, %v2267_v42 }
 0x117   : > { %v536_v33 = vpop.permute.xlu0 %535  ;;  %v534_v58 = vpop.permute.xlu1 %533 }
 0x118   : > { %v543_v18 = vsel %vm541_vm2, %v532_v25, %v534_v58  ;;  %v554_v8 = vadd.f32 %v534_v58, %v505_v53  ;;  %v1327_v25 = vmul.f32 %v2191_v5, %v2149_v54  ;;  %v1365_v53 = vmul.f32 %v2179_v0, %v2195_v6 }
 0x119   : > { %v553_v62 = vadd.f32 %v543_v18, %v504_v23  ;;  %1337 = vrot.lane.b32.xlu0 %v1324_v19, %s1945_s12  ;;  %1335 = vrot.lane.b32.xlu1 %v1323_v39, %s1945_s12  ;;  %v1364_v39 = vmul.f32 %v2164_v59, %v2195_v6  ;;  %v1367_v6 = vmul.f32 %v2191_v5, %v2207_v11 }
 0x11b   : > { %v540_v15 = vpop.permute.xlu0 %539  ;;  %v538_v16 = vpop.permute.xlu1 %537 }
 0x11c   : > { %v557_v22 = vadd.f32 %v540_v15, %v508_v24  ;;  %v544_v26 = vsel %vm541_vm2, %v536_v33, %v538_v16  ;;  %v545_v28 = vsel %vm541_vm2, %v538_v16, %v540_v15  ;;  %v1405_v15 = vmul.f32 %v2179_v0, %v2233_v27 }
 0x11d   : > { %v555_v7 = vadd.f32 %v544_v26, %v506_v10  ;;  %v556_v17 = vadd.f32 %v545_v28, %v507_v12  ;;  %1341 = vrot.lane.b32.xlu0 %v1326_v20, %s1945_s12  ;;  %1339 = vrot.lane.b32.xlu1 %v1325_v52, %s1945_s12  ;;  %v1406_v12 = vmul.f32 %v2176_v63, %v2249_v34 }
 0x11f   : > { %v581_v29 = vpop.permute.xlu0 %580  ;;  %v579_v30 = vpop.permute.xlu1 %578 }
 0x120   : > { %v591_v32 = vsel %vm590_vm3, %v579_v30, %v581_v29  ;;  %v1159_v30 = vmul.f32 %v2179_v0, %v2267_v42 }
 0x121   : > { %v601_v36 = vadd.f32 %v591_v32, %v552_v49  ;;  %1345 = vrot.lane.b32.xlu0 %v1328_v41, %s1945_s12  ;;  %1343 = vrot.lane.b32.xlu1 %v1327_v25, %s1945_s12  ;;  %v1158_v25 = vmul.f32 %v2164_v59, %v2267_v42  ;;  %v1160_v42 = vmul.f32 %v2176_v63, %v2265_v40 }
 0x123   : > { %v585_v37 = vpop.permute.xlu0 %584  ;;  %v583_v19 = vpop.permute.xlu1 %582 }
 0x124   : > { %v592_v43 = vsel %vm590_vm3, %v581_v29, %v583_v19  ;;  %v603_v44 = vadd.f32 %v583_v19, %v554_v8 }
 0x125   : > { %v602_v46 = vadd.f32 %v592_v43, %v553_v62  ;;  %1377 = vrot.lane.b32.xlu0 %v1364_v39, %s1946_s14  ;;  %1375 = vrot.lane.b32.xlu1 %v1363_v13, %s1946_s14  ;;  %v1404_v62 = vmul.f32 %v2164_v59, %v2233_v27  ;;  %v1408_v27 = vmul.f32 %v2188_v3, %v2249_v34 }
 0x126   : > { %v1162_v13 = vmul.f32 %v2188_v3, %v2265_v40 }
 0x127   : > { %v589_v54 = vpop.permute.xlu0 %588  ;;  %v587_v48 = vpop.permute.xlu1 %586 }
 0x128   : > { %v606_v55 = vadd.f32 %v589_v54, %v557_v22  ;;  %v593_v14 = vsel %vm590_vm3, %v585_v37, %v587_v48  ;;  %v594_v57 = vsel %vm590_vm3, %v587_v48, %v589_v54 }
 0x129   : > { %v604_v23 = vadd.f32 %v593_v14, %v555_v7  ;;  %v605_v33 = vadd.f32 %v594_v57, %v556_v17  ;;  %1381 = vrot.lane.b32.xlu0 %v1366_v50, %s1946_s14  ;;  %1379 = vrot.lane.b32.xlu1 %v1365_v53, %s1946_s14  ;;  %v1407_v17 = vmul.f32 %v2191_v5, %v2249_v34 }
 0x12a   : > { %v1443_v34 = vmul.f32 %v2167_v60, %v2243_v31  ;;  %v1446_v60 = vmul.f32 %v2176_v63, %v2255_v35  ;;  %v1448_v57 = vmul.f32 %v2188_v3, %v2255_v35  ;;  %v1447_v63 = vmul.f32 %v2191_v5, %v2255_v35 }
 0x12b   : > { %v630_v58 = vpop.permute.xlu0 %629  ;;  %v628_v38 = vpop.permute.xlu1 %627 }
 0x12c   : > { %v640_v18 = vsel %vm639_vm4, %v628_v38, %v630_v58 }
 0x12d   : > { %v2392_v8 = vadd.f32 %v640_v18, %v601_v36  ;;  %1385 = vrot.lane.b32.xlu0 %v1368_v1, %s1946_s14  ;;  %1383 = vrot.lane.b32.xlu1 %v1367_v6, %s1946_s14  ;;  %v1444_v36 = vmul.f32 %v2164_v59, %v2243_v31  ;;  %v1161_v59 = vmul.f32 %v2191_v5, %v2265_v40 }
 0x12f   : > { %v634_v56 = vpop.permute.xlu0 %633  ;;  %v632_v9 = vpop.permute.xlu1 %631 }
 0x130   : > { %v641_v24 = vsel %vm639_vm4, %v630_v58, %v632_v9  ;;  %v2401_v52 = vadd.f32 %v632_v9, %v603_v44 }
 0x131   : > { %v2403_v11 = vadd.f32 %v641_v24, %v602_v46  ;;  %1417 = vrot.lane.b32.xlu0 %v1404_v62, %s1947_s15  ;;  %1415 = vrot.lane.b32.xlu1 %v1403_v51, %s1947_s15  ;;  %v1445_v46 = vmul.f32 %v2179_v0, %v2243_v31 }
 0x133   : > { %v638_v61 = vpop.permute.xlu0 %637  ;;  %v636_v10 = vpop.permute.xlu1 %635 }
 0x134   : > { %v2411_v16 = vadd.f32 %v638_v61, %v606_v55  ;;  %v642_v20 = vsel %vm639_vm4, %v634_v56, %v636_v10  ;;  %v643_v21 = vsel %vm639_vm4, %v636_v10, %v638_v61 }
 0x135   : > { %v2415_v22 = vadd.f32 %v642_v20, %v604_v23  ;;  %v2417_v26 = vadd.f32 %v643_v21, %v605_v33  ;;  %1421 = vrot.lane.b32.xlu0 %v1406_v12, %s1947_s15  ;;  %1419 = vrot.lane.b32.xlu1 %v1405_v15, %s1947_s15 }
 0x137   : > { %v1178_v28 = vpop.permute.xlu0 %1177  ;;  %v1176_v7 = vpop.permute.xlu1 %1175 }
 0x138   : > { %v1187_v49 = vsel %vm443_vm0, %v1176_v7, %v1178_v28 }
 0x139   : > { %v1197_v29 = vadd.f32 %v1187_v49, %v1157_v2  ;;  %1425 = vrot.lane.b32.xlu0 %v1408_v27, %s1947_s15  ;;  %1423 = vrot.lane.b32.xlu1 %v1407_v17, %s1947_s15 }
 0x13b   : > { %v1182_v41 = vpop.permute.xlu0 %1181  ;;  %v1180_v32 = vpop.permute.xlu1 %1179 }
 0x13c   : > { %v1188_v37 = vsel %vm443_vm0, %v1178_v28, %v1180_v32  ;;  %v1199_v19 = vadd.f32 %v1180_v32, %v1159_v30 }
 0x13d   : > { %v1198_v39 = vadd.f32 %v1188_v37, %v1158_v25  ;;  %1457 = vrot.lane.b32.xlu0 %v1444_v36, %s1948_s16  ;;  %1455 = vrot.lane.b32.xlu1 %v1443_v34, %s1948_s16 }
 0x13f   : > { %v1186_v43 = vpop.permute.xlu0 %1185  ;;  %v1184_v44 = vpop.permute.xlu1 %1183 }
 0x140   : > { %v1202_v54 = vadd.f32 %v1186_v43, %v1162_v13  ;;  %v1189_v48 = vsel %vm443_vm0, %v1182_v41, %v1184_v44  ;;  %v1190_v50 = vsel %vm443_vm0, %v1184_v44, %v1186_v43 }
 0x141   : > { %v1200_v53 = vadd.f32 %v1189_v48, %v1160_v42  ;;  %v1201_v55 = vadd.f32 %v1190_v50, %v1161_v59  ;;  %1461 = vrot.lane.b32.xlu0 %v1446_v60, %s1948_s16  ;;  %1459 = vrot.lane.b32.xlu1 %v1445_v46, %s1948_s16 }
 0x143   : > { %v679_v14 = vpop.permute.xlu0 %678  ;;  %v677_v40 = vpop.permute.xlu1 %676 }
 0x144   : > { %v689_v34 = vsel %vm688_vm5, %v677_v40, %v679_v14 }
 0x145   : > { %1465 = vrot.lane.b32.xlu0 %v1448_v57, %s1948_s16  ;;  %1463 = vrot.lane.b32.xlu1 %v1447_v63, %s1948_s16  ;;  %v699_v42 = vadd.f32 %v689_v34, %v2392_v8 }
 0x147   : > { %v683_v0 = vpop.permute.xlu0 %682  ;;  %v681_v31 = vpop.permute.xlu1 %680 }
 0x148   : > { %v690_v44 = vsel %vm688_vm5, %v679_v14, %v681_v31  ;;  %v701_v48 = vadd.f32 %v681_v31, %v2401_v52 }
 0x14b   : > { %v687_v23 = vpop.permute.xlu0 %686  ;;  %v685_v33 = vpop.permute.xlu1 %684 }
 0x14c   : > { %v691_v57 = vsel %vm688_vm5, %v683_v0, %v685_v33  ;;  %v692_v8 = vsel %vm688_vm5, %v685_v33, %v687_v23  ;;  %v704_v14 = vadd.f32 %v687_v23, %v2411_v16 }
 0x14d   : > { %v702_v0 = vadd.f32 %v691_v57, %v2415_v22  ;;  %v703_v33 = vadd.f32 %v692_v8, %v2417_v26 }
 0x14f   : > { %v1218_v58 = vpop.permute.xlu0 %1217  ;;  %v1216_v38 = vpop.permute.xlu1 %1215 }
 0x150   : > { %v1227_v1 = vsel %vm492_vm1, %v1216_v38, %v1218_v58 }
 0x151   : > { %v1237_v6 = vadd.f32 %v1227_v1, %v1197_v29 }
 0x153   : > { %v1222_v18 = vpop.permute.xlu0 %1221  ;;  %v1220_v56 = vpop.permute.xlu1 %1219 }
 0x154   : > { %v1228_v3 = vsel %vm492_vm1, %v1218_v58, %v1220_v56  ;;  %v1239_v9 = vadd.f32 %v1220_v56, %v1199_v19  ;;  %v850_v58 = vlaneseq }
 0x155   : > { %v1238_v62 = vadd.f32 %v1228_v3, %v1198_v39 }
 0x156   : > { %v851_v23 = vshrl.u32 %v850_v58, 7 }
 0x157   : > { %v1226_v5 = vpop.permute.xlu0 %1225  ;;  %v1224_v35 = vpop.permute.xlu1 %1223 }
 0x158   : > { %v1242_v51 = vadd.f32 %v1226_v5, %v1202_v54  ;;  %v1229_v24 = vsel %vm492_vm1, %v1222_v18, %v1224_v35  ;;  %v1230_v61 = vsel %vm492_vm1, %v1224_v35, %v1226_v5 }
 0x159   : > { %v1240_v10 = vadd.f32 %v1229_v24, %v1200_v53  ;;  %v2465_v12 = vadd.f32 %v1230_v61, %v1201_v55  ;;  %v700_v55 = vadd.f32 %v690_v44, %v2403_v11 }
 0x15b   : > { %v728_v15 = vpop.permute.xlu0 %727  ;;  %v726_v20 = vpop.permute.xlu1 %725 }
 0x15c   : > { %v738_v39 = vsel %vm737_vm6, %v726_v20, %v728_v15 }
 0x15d   : > { %v748_v60 = vadd.f32 %v738_v39, %v699_v42 }
 0x15f   : > { %v732_v21 = vpop.permute.xlu0 %731  ;;  %v730_v28 = vpop.permute.xlu1 %729 }
 0x160   : > { %v739_v50 = vsel %vm737_vm6, %v728_v15, %v730_v28  ;;  %v750_v63 = vadd.f32 %v730_v28, %v701_v48 }
 0x161   : > { %v749_v38 = vadd.f32 %v739_v50, %v700_v55 }
 0x163   : > { %v736_v2 = vpop.permute.xlu0 %735  ;;  %v734_v7 = vpop.permute.xlu1 %733 }
 0x164   : > { %v740_v31 = vsel %vm737_vm6, %v732_v21, %v734_v7  ;;  %v741_v18 = vsel %vm737_vm6, %v734_v7, %v736_v2 }
 0x165   : > { %v751_v5 = vadd.f32 %v740_v31, %v702_v0  ;;  %v752_v35 = vadd.f32 %v741_v18, %v703_v33 }
 0x167   : > { %v1258_v27 = vpop.permute.xlu0 %1257  ;;  %v1256_v17 = vpop.permute.xlu1 %1255 }
 0x168   : > { %v1267_v49 = vsel %vm541_vm2, %v1256_v17, %v1258_v27 }
 0x169   : > { %v2468_v29 = vadd.f32 %v1267_v49, %v1237_v6  ;;  %v860_v49 = vsub.s32 2, %v851_v23 }
 0x16b   : > { %v1262_v30 = vpop.permute.xlu0 %1261  ;;  %v1260_v41 = vpop.permute.xlu1 %1259 }
 0x16c   : > { %v1268_v25 = vsel %vm541_vm2, %v1258_v27, %v1260_v41  ;;  %v2471_v32 = vadd.f32 %v1260_v41, %v1239_v9 }
 0x16d   : > { %v2473_v36 = vadd.f32 %v1268_v25, %v1238_v62  ;;  %v753_v62 = vadd.f32 %v736_v2, %v704_v14 }
 0x16f   : > { %v2476_v37 = vpop.permute.xlu0 %1265  ;;  %v2478_v19 = vpop.permute.xlu1 %1263 }
 0x170   : > { %v2482_v13 = vadd.f32 %v2476_v37, %v1242_v51  ;;  %v1269_v43 = vsel %vm541_vm2, %v1262_v30, %v2478_v19 }
 0x171   : > { %v2487_v59 = vadd.f32 %v1269_v43, %v1240_v10  ;;  %v856_v43 = vsub.s32 1, %v851_v23 }
 0x173   : > { %v777_v46 = vpop.permute.xlu0 %776  ;;  %v775_v54 = vpop.permute.xlu1 %774 }
 0x174   : > { %v787_v53 = vsel %vm786_vm7, %v775_v54, %v777_v46 }
 0x175   : > { %v797_v40 = vadd.f32 %v787_v53, %v748_v60  ;;  %v373_v53 = vld [vmem:[%s2764_s3] sm:$0x7] }
 0x176   : > { %v2519_v57 = vrot.slane %v373_v53, %v860_v49 }
 0x177   : > { %v813_v1 = vadd.f32 %v2277_v45, %v797_v40  ;;  %v781_v6 = vpop.permute.xlu0 %780  ;;  %v779_v52 = vpop.permute.xlu1 %778 }
 0x178   : > { %v788_v11 = vsel %vm786_vm7, %v777_v46, %v779_v52  ;;  %v799_v56 = vadd.f32 %v779_v52, %v750_v63  ;;  %v2514_v46 = vsub.s32 0, %v851_v23 }
 0x179   : > { %v819_v3 = vadd.f32 3.0, %v813_v1  ;;  %v798_v9 = vadd.f32 %v788_v11, %v749_v38 }
 0x17a   : > { %v815_v16 = vadd.f32 %v2277_v45, %v799_v56  ;;  %v2528_v11 = vrot.slane %v373_v53, %v2514_v46 }
 0x17b   : > { %v825_v51 = vmax.f32 %v819_v3, 0.0  ;;  %v814_v24 = vadd.f32 %v2277_v45, %v798_v9  ;;  %v785_v61 = vpop.permute.xlu0 %784  ;;  %v783_v10 = vpop.permute.xlu1 %782 }
 0x17c   : > { %v821_v15 = vadd.f32 3.0, %v815_v16  ;;  %v802_v20 = vadd.f32 %v785_v61, %v753_v62  ;;  %v789_v21 = vsel %vm786_vm7, %v781_v6, %v783_v10  ;;  %v790_v22 = vsel %vm786_vm7, %v783_v10, %v785_v61 }
 0x17d   : > { %v831_v26 = vmin.f32 %v825_v51, 6.0  ;;  %v820_v28 = vadd.f32 3.0, %v814_v24  ;;  %v800_v7 = vadd.f32 %v789_v21, %v751_v5  ;;  %v801_v2 = vadd.f32 %v790_v22, %v752_v35 }
 0x17e   : > { %v827_v27 = vmax.f32 %v821_v15, 0.0  ;;  %v818_v17 = vadd.f32 %v2279_v47, %v802_v20  ;;  %v2521_v6 = vrot.slane %v373_v53, %v856_v43 }
 0x17f   : > { %v826_v30 = vmax.f32 %v820_v28, 0.0  ;;  %v816_v41 = vadd.f32 %v2279_v47, %v800_v7  ;;  %v817_v25 = vadd.f32 %v2279_v47, %v801_v2  ;;  %v2510_v34 = vpop.permute.xlu0 %1297  ;;  %v2512_v39 = vpop.permute.xlu1 %1295  ;;  %v837_v42 = vmul.f32 0.16666667, %v831_v26 }
 0x180   : > { %v833_v44 = vmin.f32 %v827_v27, 6.0  ;;  %v824_v60 = vadd.f32 3.0, %v818_v17 }
 0x181   : > { %v832_v54 = vmin.f32 %v826_v30, 6.0  ;;  %v822_v48 = vadd.f32 3.0, %v816_v41  ;;  %v823_v50 = vadd.f32 3.0, %v817_v25  ;;  %v2523_v52 = vmul.f32 %v837_v42, %v813_v1 }
 0x182   : > { %v839_v55 = vmul.f32 0.16666667, %v833_v44  ;;  %v830_v40 = vmax.f32 %v824_v60, 0.0 }
 0x183   : > { %v838_v8 = vmul.f32 0.16666667, %v832_v54  ;;  %v828_v63 = vmax.f32 %v822_v48, 0.0  ;;  %v829_v58 = vmax.f32 %v823_v50, 0.0  ;;  %v1302_v14 = vpop.permute.xlu0 %1301  ;;  %v1300_v38 = vpop.permute.xlu1 %1299  ;;  %v865_v51 = vmul.f32 %v2528_v11, %v2523_v52 }
 0x184   : > { %v2525_v31 = vmul.f32 %v839_v55, %v815_v16  ;;  %v836_v18 = vmin.f32 %v830_v40, 6.0  ;;  %v1307_v55 = vsel %vm590_vm3, %v2512_v39, %v2510_v34  ;;  %v1319_v39 = vadd.f32 %v1300_v38, %v2471_v32 }
 0x185   : > { %v2530_v56 = vmul.f32 %v838_v8, %v814_v24  ;;  %v834_v0 = vmin.f32 %v828_v63, 6.0  ;;  %v835_v33 = vmin.f32 %v829_v58, 6.0  ;;  %v1317_v58 = vadd.f32 %v1307_v55, %v2468_v29 }
 0x186   : > { %v842_v3 = vmul.f32 0.16666667, %v836_v18  ;;  %v867_v1 = vmul.f32 %v2519_v57, %v2525_v31  ;;  %v1270_v18 = vsel %vm541_vm2, %v2478_v19, %v2476_v37 }
 0x187   : > { %v840_v9 = vmul.f32 0.16666667, %v834_v0  ;;  %v841_v62 = vmul.f32 0.16666667, %v835_v33  ;;  %v1306_v23 = vpop.permute.xlu0 %1305  ;;  %v1304_v5 = vpop.permute.xlu1 %1303  ;;  %v866_v35 = vmul.f32 %v2521_v6, %v2530_v56  ;;  %v1308_v0 = vsel %vm590_vm3, %v2510_v34, %v1300_v38 }
 0x188   : > { %v2536_v16 = vmul.f32 %v842_v3, %v818_v17  ;;  %v873_v22 = vsel %vm872_vm8, %v867_v1, 0.0  ;;  %v1318_v37 = vadd.f32 %v1308_v0, %v2473_v36  ;;  %v1322_v34 = vadd.f32 %v1306_v23, %v2482_v13 }
 0x189   : > { %v2540_v24 = vmul.f32 %v840_v9, %v816_v41  ;;  %v2542_v61 = vmul.f32 %v841_v62, %v817_v25  ;;  %v871_v10 = vadd.f32 %v866_v35, %v865_v51  ;;  %v1309_v35 = vsel %vm590_vm3, %v1302_v14, %v1304_v5 }
 0x18a   : > { %v870_v15 = vmul.f32 %v2519_v57, %v2536_v16  ;;  %v1281_v51 = vadd.f32 %v1270_v18, %v2465_v12  ;;  %v1320_v32 = vadd.f32 %v1309_v35, %v2487_v59 }
 0x18b   : > { %v1338_v20 = vpop.permute.xlu0 %1337  ;;  %v1336_v21 = vpop.permute.xlu1 %1335  ;;  %v868_v26 = vmul.f32 %v2528_v11, %v2540_v24  ;;  %v869_v28 = vmul.f32 %v2521_v6, %v2542_v61  ;;  %v874_v7 = vadd.f32 %v873_v22, %v871_v10  ;;  %v1310_v10 = vsel %vm590_vm3, %v1304_v5, %v1306_v23 }
 0x18c   : > { %v878_v27 = vsel %vm872_vm8, %v870_v15, 0.0  ;;  %v1347_v63 = vsel %vm639_vm4, %v1336_v21, %v1338_v20 }
 0x18d   : > { %v877_v2 = vadd.f32 %v869_v28, %v868_v26  ;;  %875 = vadd.xlane.f32.xlu1 %v874_v7  ;;  %v1357_v3 = vadd.f32 %v1347_v63, %v1317_v58  ;;  %v1321_v7 = vadd.f32 %v1310_v10, %v1281_v51 }
 0x18f   : > { %v1342_v17 = vpop.permute.xlu0 %1341  ;;  %v1340_v49 = vpop.permute.xlu1 %1339  ;;  %v879_v30 = vadd.f32 %v878_v27, %v877_v2 }
 0x190   : > { %v1348_v1 = vsel %vm639_vm4, %v1338_v20, %v1340_v49  ;;  %v1359_v15 = vadd.f32 %v1340_v49, %v1319_v39 }
 0x191   : > { %880 = vadd.xlane.f32.xlu0 %v879_v30  ;;  %v1358_v38 = vadd.f32 %v1348_v1, %v1318_v37 }
 0x193   : > { %v1346_v41 = vpop.permute.xlu0 %1345  ;;  %v1344_v25 = vpop.permute.xlu1 %1343 }
 0x194   : > { %v1349_v14 = vsel %vm639_vm4, %v1342_v17, %v1344_v25  ;;  %v1350_v12 = vsel %vm639_vm4, %v1344_v25, %v1346_v41  ;;  %v1362_v23 = vadd.f32 %v1346_v41, %v1322_v34 }
 0x195   : > { %v1360_v27 = vadd.f32 %v1349_v14, %v1320_v32  ;;  %v1361_v30 = vadd.f32 %v1350_v12, %v1321_v7 }
 0x197   : > { %v1378_v43 = vpop.permute.xlu0 %1377  ;;  %v1376_v42 = vpop.permute.xlu1 %1375 }
 0x198   : > { %v1387_v33 = vsel %vm688_vm5, %v1376_v42, %v1378_v43 }
 0x199   : > { %v1397_v19 = vadd.f32 %v1387_v33, %v1357_v3 }
 0x19b   : > { %v1382_v44 = vpop.permute.xlu0 %1381  ;;  %v1380_v60 = vpop.permute.xlu1 %1379 }
 0x19c   : > { %v1388_v21 = vsel %vm688_vm5, %v1378_v43, %v1380_v60  ;;  %v1399_v28 = vadd.f32 %v1380_v60, %v1359_v15 }
 0x19d   : > { %v1398_v5 = vadd.f32 %v1388_v21, %v1358_v38 }
 0x19f   : > { %v1386_v54 = vpop.permute.xlu0 %1385  ;;  %v1384_v48 = vpop.permute.xlu1 %1383 }
 0x1a0   : > { %v1389_v59 = vsel %vm688_vm5, %v1382_v44, %v1384_v48  ;;  %v1390_v49 = vsel %vm688_vm5, %v1384_v48, %v1386_v54  ;;  %v1402_v43 = vadd.f32 %v1386_v54, %v1362_v23 }
 0x1a1   : > { %v1400_v58 = vadd.f32 %v1389_v59, %v1360_v27  ;;  %v1401_v18 = vadd.f32 %v1390_v49, %v1361_v30 }
 0x1a3   : > { %v1418_v50 = vpop.permute.xlu0 %1417  ;;  %v1416_v53 = vpop.permute.xlu1 %1415 }
 0x1a4   : > { %v1427_v29 = vsel %vm737_vm6, %v1416_v53, %v1418_v50 }
 0x1a5   : > { %v1437_v20 = vadd.f32 %v1427_v29, %v1397_v19 }
 0x1a7   : > { %v1422_v40 = vpop.permute.xlu0 %1421  ;;  %v1420_v8 = vpop.permute.xlu1 %1419 }
 0x1a8   : > { %v1428_v36 = vsel %vm737_vm6, %v1418_v50, %v1420_v8  ;;  %v1439_v17 = vadd.f32 %v1420_v8, %v1399_v28 }
 0x1a9   : > { %v1438_v42 = vadd.f32 %v1428_v36, %v1398_v5 }
 0x1ab   : > { %v1426_v9 = vpop.permute.xlu0 %1425  ;;  %v1424_v62 = vpop.permute.xlu1 %1423 }
 0x1ac   : > { %v1429_v50 = vsel %vm737_vm6, %v1422_v40, %v1424_v62  ;;  %v1430_v55 = vsel %vm737_vm6, %v1424_v62, %v1426_v9  ;;  %v1442_v48 = vadd.f32 %v1426_v9, %v1402_v43 }
 0x1ad   : > { %v1440_v54 = vadd.f32 %v1429_v50, %v1400_v58  ;;  %v1441_v33 = vadd.f32 %v1430_v55, %v1401_v18 }
 0x1af   : > { %v1458_v22 = vpop.permute.xlu0 %1457  ;;  %v1456_v26 = vpop.permute.xlu1 %1455 }
 0x1b0   : > { %v1467_v13 = vsel %vm786_vm7, %v1456_v26, %v1458_v22 }
 0x1b1   : > { %v1477_v2 = vadd.f32 %v1467_v13, %v1437_v20 }
 0x1b3   : > { %v1483_v25 = vadd.f32 %v1477_v2, %v2277_v45  ;;  %v1462_v60 = vpop.permute.xlu0 %1461  ;;  %v1460_v53 = vpop.permute.xlu1 %1459 }
 0x1b4   : > { %v1468_v41 = vsel %vm786_vm7, %v1458_v22, %v1460_v53  ;;  %v1479_v63 = vadd.f32 %v1460_v53, %v1439_v17 }
 0x1b5   : > { %v1489_v44 = vadd.f32 3.0, %v1483_v25  ;;  %v1478_v0 = vadd.f32 %v1468_v41, %v1438_v42 }
 0x1b6   : > { %v1485_v8 = vadd.f32 %v1479_v63, %v2277_v45 }
 0x1b7   : > { %v1495_v3 = vmax.f32 %v1489_v44, 0.0  ;;  %v1484_v39 = vadd.f32 %v1478_v0, %v2277_v45  ;;  %v1466_v35 = vpop.permute.xlu0 %1465  ;;  %v1464_v1 = vpop.permute.xlu1 %1463 }
 0x1b8   : > { %v1491_v40 = vadd.f32 3.0, %v1485_v8  ;;  %v1482_v29 = vadd.f32 %v1466_v35, %v1442_v48  ;;  %v1469_v62 = vsel %vm786_vm7, %v1462_v60, %v1464_v1  ;;  %v1470_v51 = vsel %vm786_vm7, %v1464_v1, %v1466_v35 }
 0x1b9   : > { %v1501_v37 = vmin.f32 %v1495_v3, 6.0  ;;  %v1490_v19 = vadd.f32 3.0, %v1484_v39  ;;  %v1480_v34 = vadd.f32 %v1469_v62, %v1440_v54  ;;  %v1481_v10 = vadd.f32 %v1470_v51, %v1441_v33  ;;  %v374_v3 = vld [vmem:[%s2765_s4] sm:$0xff] }
 0x1ba   : > { %v1497_v9 = vmax.f32 %v1491_v40, 0.0  ;;  %v1488_v15 = vadd.f32 %v1482_v29, %v2279_v47 }
 0x1bb   : > { %v1507_v21 = vmul.f32 0.16666667, %v1501_v37  ;;  %v1496_v32 = vmax.f32 %v1490_v19, 0.0  ;;  %v1486_v38 = vadd.f32 %v1480_v34, %v2279_v47  ;;  %v1487_v45 = vadd.f32 %v1481_v10, %v2279_v47 }
 0x1bc   : > { %v1503_v14 = vmin.f32 %v1497_v9, 6.0  ;;  %v1494_v20 = vadd.f32 3.0, %v1488_v15  ;;  %v376_v9 = vld [vmem:[%s2766_s5] sm:$0x1] }
 0x1bd   : > { %v1502_v22 = vmin.f32 %v1496_v32, 6.0  ;;  %v1492_v26 = vadd.f32 3.0, %v1486_v38  ;;  %v1493_v12 = vadd.f32 3.0, %v1487_v45  ;;  %v2590_v13 = vmul.f32 %v1507_v21, %v1483_v25 }
 0x1be   : > { %v1509_v28 = vmul.f32 0.16666667, %v1503_v14  ;;  %v1500_v36 = vmax.f32 %v1494_v20, 0.0 }
 0x1bf   : > { %v1508_v7 = vmul.f32 0.16666667, %v1502_v22  ;;  %v1498_v23 = vmax.f32 %v1492_v26, 0.0  ;;  %v1499_v5 = vmax.f32 %v1493_v12, 0.0  ;;  %v1519_v25 = vmul.f32 %v2590_v13, %v2528_v11 }
 0x1c0   : > { %v2592_v2 = vmul.f32 %v1509_v28, %v1485_v8  ;;  %v1506_v27 = vmin.f32 %v1500_v36, 6.0 }
 0x1c1   : > { %v2594_v59 = vmul.f32 %v1508_v7, %v1484_v39  ;;  %v1504_v49 = vmin.f32 %v1498_v23, 6.0  ;;  %v1505_v17 = vmin.f32 %v1499_v5, 6.0 }
 0x1c2   : > { %v1512_v47 = vmul.f32 0.16666667, %v1506_v27  ;;  %v1521_v30 = vmul.f32 %v2592_v2, %v2519_v57 }
 0x1c3   : > { %v1510_v43 = vmul.f32 0.16666667, %v1504_v49  ;;  %v1511_v42 = vmul.f32 0.16666667, %v1505_v17  ;;  %v1520_v60 = vmul.f32 %v2594_v59, %v2521_v6 }
 0x1c4   : > { %v2602_v53 = vmul.f32 %v1512_v47, %v1488_v15  ;;  %v1526_v63 = vsel %vm872_vm8, %v1521_v30, 0.0 }
 0x1c5   : > { %v2604_v50 = vmul.f32 %v1510_v43, %v1486_v38  ;;  %v2606_v55 = vmul.f32 %v1511_v42, %v1487_v45  ;;  %v1525_v41 = vadd.f32 %v1520_v60, %v1519_v25  ;;  %v378_v38 = vld [vmem:[%s2767_s6 + $0x8] sm:$0xff]  ;;  %v377_v45 = vld [vmem:[%s2767_s6] sm:$0xff] }
 0x1c6   : > { %v1524_v58 = vmul.f32 %v2602_v53, %v2519_v57  ;;  %v375_v57 = vld [vmem:[%s2765_s4 + $0x8] sm:$0xff] }
 0x1c7   : > { %v1527_v18 = vadd.f32 %v1526_v63, %v1525_v41  ;;  %v1522_v44 = vmul.f32 %v2604_v50, %v2528_v11  ;;  %v1523_v0 = vmul.f32 %v2606_v55, %v2521_v6 }
 0x1c8   : > { %v1531_v8 = vsel %vm872_vm8, %v1524_v58, 0.0 }
 0x1c9   : > { %1528 = vadd.xlane.f32.xlu0 %v1527_v18  ;;  %v1530_v48 = vadd.f32 %v1523_v0, %v1522_v44 }
 0x1cb   : > { %v1532_v54 = vadd.f32 %v1531_v8, %v1530_v48 }
 0x1cd   : > { %1533 = vadd.xlane.f32.xlu1 %v1532_v54  ;;  %v379_v54 = vld [vmem:[%s2768_s7] sm:$0xff] }
 0x21a   : > { %v876_v33 = vpop.xlane.xlu1 %875 }
 0x21b   : > { %v882_v39 = vmul.f32 0.00390625, %v876_v33  ;;  %v380_v33 = vld [vmem:[%s2768_s7 + $0x8] sm:$0xff] }
 0x21d   : > { %v884_v35 = vmul.f32 %v882_v39, %v374_v3 }
 0x21e   : > { %v881_v11 = vpop.xlane.xlu0 %880 }
 0x21f   : > { %v883_v1 = vmul.f32 0.00390625, %v881_v11  ;;  %v887_v40 = vsel %vm886_vm9, %v884_v35, 0.0 }
 0x221   : > { %v885_v6 = vmul.f32 %v883_v1, %v375_v57 }
 0x223   : > { %v888_v29 = vsel %vm886_vm9, %v885_v6, 0.0 }
 0x224   : > { %v889_v62 = vadd.f32 %v888_v29, %v887_v40 }
 0x226   : > { %v890_v51 = vrot.slane %v889_v62, 4 }
 0x228   : > { %v891_v37 = vadd.f32 %v890_v51, %v889_v62 }
 0x22a   : > { %v892_v19 = vrot.slane %v891_v37, 2 }
 0x22c   : > { %v893_v34 = vadd.f32 %v892_v19, %v891_v37  ;;  %v1922_v37 = vld [vmem:[%s2769_s8] sm:$0xff]  }
 0x22d   : > { %1871 = vmatprep.mubr.msk.bf16.mxu1 %vm969_vm10, %v1922_v37 }
 0x22e   : > { %v894_v10 = vrot.slane %v893_v34, 1 }
 0x230   : > { %v895_v15 = vadd.f32 %v894_v10, %v893_v34 }
 0x232   : > { %v896_v21 = vadd.f32 %v895_v15, %v376_v9 }
 0x234   : > { %v897_v32 = vmax.f32 %v896_v21, 0.0 }
 0x236   : > { %v901_v14 = vrot.slane %v897_v32, %v2514_v46 }
 0x238   : > { %v903_v20 = vmul.f32 %v901_v14, %v378_v38  ;;  %v902_v22 = vmul.f32 %v901_v14, %v377_v45 }
 0x23a   : > { %v907_v26 = vsel %vm886_vm9, %v903_v20, 0.0  ;;  %v904_v12 = vsel %vm886_vm9, %v902_v22, 0.0 }
 0x23b   : > { %908 = vadd.xlane.f32.xlu1 %v907_v26  ;;  %905 = vadd.xlane.f32.xlu0 %v904_v12  ;;  %v385_v26 = vld [vmem:[%s2770_s9] sm:$0xff]  ;;  %v386_v12 = vld [vmem:[%s2770_s9 + $0x8] sm:$0xff] }
 0x256   : > { %v1529_v28 = vpop.xlane.xlu0 %1528 }
 0x257   : > { %v1535_v36 = vmul.f32 0.00390625, %v1529_v28  ;;  %v387_v28 = vld [vmem:[%s2770_s9 + $0x10] sm:$0xff] }
 0x259   : > { %v1537_v23 = vmul.f32 %v1535_v36, %v374_v3  ;;  %v388_v36 = vld [vmem:[%s2770_s9 + $0x18] sm:$0xff] }
 0x25a   : > { %v1534_v7 = vpop.xlane.xlu1 %1533 }
 0x25b   : > { %v1536_v5 = vmul.f32 0.00390625, %v1534_v7  ;;  %v1539_v49 = vsel %vm886_vm9, %v1537_v23, 0.0 }
 0x25d   : > { %v1538_v27 = vmul.f32 %v1536_v5, %v375_v57 }
 0x25f   : > { %v1540_v17 = vsel %vm886_vm9, %v1538_v27, 0.0 }
 0x260   : > { %v1541_v47 = vadd.f32 %v1540_v17, %v1539_v49 }
 0x262   : > { %v1542_v30 = vrot.slane %v1541_v47, 4 }
 0x264   : > { %v1543_v43 = vadd.f32 %v1542_v30, %v1541_v47 }
 0x266   : > { %v1544_v42 = vrot.slane %v1543_v43, 2 }
 0x268   : > { %v1545_v25 = vadd.f32 %v1544_v42, %v1543_v43 }
 0x26a   : > { %v1546_v60 = vrot.slane %v1545_v25, 1 }
 0x26c   : > { %v1547_v41 = vadd.f32 %v1546_v60, %v1545_v25  ;;  %v1923_v60 = vld [vmem:[%s2769_s8 + $0x8] sm:$0xff]  }
 0x26e   : > { %v1548_v63 = vadd.f32 %v1547_v41, %v376_v9 }
 0x270   : > { %v1549_v58 = vmax.f32 %v1548_v63, 0.0 }
 0x272   : > { %v1553_v18 = vrot.slane %v1549_v58, %v2514_v46 }
 0x274   : > { %v1555_v44 = vmul.f32 %v1553_v18, %v378_v38  ;;  %v1554_v0 = vmul.f32 %v1553_v18, %v377_v45 }
 0x276   : > { %v1559_v48 = vsel %vm886_vm9, %v1555_v44, 0.0  ;;  %v1556_v8 = vsel %vm886_vm9, %v1554_v0, 0.0 }
 0x277   : > { %1560 = vadd.xlane.f32.xlu1 %v1559_v48  ;;  %1557 = vadd.xlane.f32.xlu0 %v1556_v8 }
 0x2c8   : > { %v906_v3 = vpop.xlane.xlu0 %905  ;;  %v909_v39 = vpop.xlane.xlu1 %908 }
 0x2c9   : > { %v910_v57 = vadd.f32 %v906_v3, %v379_v54  ;;  %v911_v46 = vadd.f32 %v909_v39, %v380_v33 }
 0x2cb   : > { %v912_v11 = vadd.f32 3.0, %v910_v57  ;;  %v913_v35 = vadd.f32 3.0, %v911_v46 }
 0x2cd   : > { %v914_v1 = vmax.f32 %v912_v11, 0.0  ;;  %v915_v6 = vmax.f32 %v913_v35, 0.0 }
 0x2cf   : > { %v916_v40 = vmin.f32 %v914_v1, 6.0  ;;  %v917_v29 = vmin.f32 %v915_v6, 6.0 }
 0x2d1   : > { %v918_v62 = vmul.f32 0.16666667, %v916_v40  ;;  %v919_v51 = vmul.f32 0.16666667, %v917_v29 }
 0x2d3   : > { %922 = vperm.xlu0 %1920, %v918_v62   ;;  %927 = vperm.xlu1 %1921, %v919_v51  }
 0x304   : > { %v1558_v19 = vpop.xlane.xlu0 %1557  ;;  %v1561_v34 = vpop.xlane.xlu1 %1560 }
 0x305   : > { %v1562_v10 = vadd.f32 %v1558_v19, %v379_v54  ;;  %v1563_v9 = vadd.f32 %v1561_v34, %v380_v33 }
 0x307   : > { %v1564_v15 = vadd.f32 3.0, %v1562_v10  ;;  %v1565_v21 = vadd.f32 3.0, %v1563_v9 }
 0x309   : > { %v1566_v32 = vmax.f32 %v1564_v15, 0.0  ;;  %v1567_v38 = vmax.f32 %v1565_v21, 0.0 }
 0x30b   : > { %v1568_v45 = vmin.f32 %v1566_v32, 6.0  ;;  %v1569_v14 = vmin.f32 %v1567_v38, 6.0 }
 0x30d   : > { %v1570_v20 = vmul.f32 0.16666667, %v1568_v45  ;;  %v1571_v22 = vmul.f32 0.16666667, %v1569_v14 }
 0x30f   : > { %1574 = vperm.xlu1 %1921, %v1570_v20   ;;  %1579 = vperm.xlu0 %1920, %v1571_v22  }
 0x313   : > { %941 = vperm.xlu1 %1921, %v385_v26   ;;  %946 = vperm.xlu0 %1920, %v386_v12  }
 0x317   : > { %951 = vperm.xlu1 %1921, %v387_v28   ;;  %956 = vperm.xlu0 %1920, %v388_v36  }
 0x352   : > { %v923_v7 = vpop.permute.xlu0 %922  ;;  %v928_v23 = vpop.permute.xlu1 %927 }
 0x353   : > { %v931_v5 = vmul.f32 %v923_v7, %v2530_v56  ;;  %v934_v27 = vmul.f32 %v928_v23, %v2542_v61  ;;  %v932_v49 = vmul.f32 %v923_v7, %v2525_v31  ;;  %v935_v17 = vmul.f32 %v928_v23, %v2536_v16 }
 0x354   : > { %v930_v47 = vmul.f32 %v923_v7, %v2523_v52  ;;  %v933_v30 = vmul.f32 %v928_v23, %v2540_v24 }
 0x355   : > { %v937_v43 = vpack.c.bf16 %v934_v27, %v931_v5  ;;  %v938_v42 = vpack.c.bf16 %v935_v17, %v932_v49 }
 0x356   : > { %v936_v25 = vpack.c.bf16 %v933_v30, %v930_v47 }
 0x357   : > { %976 = vmatprep.subr.bf16.mxu0 %v937_v43  ;;  %1869 = vmatprep.subr.bf16.mxu1 %v938_v42 }
 0x358   : > { %977 = vmatpush1.bf16.msra.mxu0 %v936_v25  ;;  %1870 = vmatpush3.bf16.msra.mxu1 %v938_v42 }
 0x35b   : > { %1835 = vmatmul.mubr.msk.bf16.vlgmr.msra.gmra.mrb[0].mxu0 %vm969_vm10, %v1922_v37  ;;  %1872 = vmatmul.mubr.msk.bf16.vlgmr.msra.gmra.mrb[0].mxu1 %vm969_vm10, %v1923_v60 }
 0x35c   : > { %1018 = vmatprep.mubr.bf16.mxu0 %v1934_v4  ;;  %1623 = vmatprep.mubr.bf16.mxu1 %v1934_v4 }
 0x363   : > { %1836 = vmatmul.mubr.msk.bf16.gmra.mrb[4].mxu0 %vm969_vm10, %v1923_v60 }
 0x364   : > { %1877 = vmatprep.mubr.msk.bf16.mxu0 %vm969_vm10, %v1922_v37 }
 0x38e   : > { %v1580_v52 = vpop.permute.xlu0 %1579  ;;  %v1575_v31 = vpop.permute.xlu1 %1574 }
 0x38f   : > { %v1585_v56 = vmul.f32 %v1580_v52, %v2604_v50  ;;  %v1586_v16 = vmul.f32 %v1580_v52, %v2606_v55  ;;  %v1587_v24 = vmul.f32 %v1580_v52, %v2602_v53  ;;  %v1582_v61 = vmul.f32 %v1575_v31, %v2590_v13 }
 0x390   : > { %v1583_v41 = vmul.f32 %v1575_v31, %v2594_v59  ;;  %v1584_v63 = vmul.f32 %v1575_v31, %v2592_v2 }
 0x391   : > { %v1588_v58 = vpack.c.bf16 %v1585_v56, %v1582_v61 }
 0x392   : > { %v1589_v18 = vpack.c.bf16 %v1586_v16, %v1583_v41  ;;  %v1590_v44 = vpack.c.bf16 %v1587_v24, %v1584_v63  ;;  %v2688_v13 = vpop.permute.xlu0 %946  ;;  %v2690_v59 = vpop.permute.xlu1 %941 }
 0x394   : > { %1591 = vmatprep.subr.bf16.mxu1 %v1589_v18  ;;  %1875 = vmatprep.subr.bf16.mxu0 %v1590_v44 }
 0x395   : > { %1592 = vmatpush1.bf16.msra.mxu1 %v1588_v58  ;;  %1876 = vmatpush3.bf16.msra.mxu0 %v1590_v44 }
 0x396   : > { %v2692_v2 = vpop.permute.xlu0 %956  ;;  %v2694_v53 = vpop.permute.xlu1 %951 }
 0x398   : > { %1845 = vmatmul.mubr.msk.bf16.vlgmr.msra.gmra.mrb[4].mxu1 %vm969_vm10, %v1922_v37  ;;  %1878 = vmatmul.mubr.msk.bf16.vlgmr.msra.gmra.mrb[8].mxu0 %vm969_vm10, %v1923_v60 }
 0x399   : > { %1633 = vmatprep.mubr.bf16.mxu1 %v1934_v4 }
 0x3a0   : > { %1846 = vmatmul.mubr.msk.bf16.gmra.mrb[8].mxu1 %vm969_vm10, %v1923_v60 }
 0x42e   : > { %v1010_v50 = vpop.f32.mrb[0].mxu0  ;;  %v1873_v55 = vpop.f32.mrb[0].mxu1 }
 0x42f   : > { %v1011_v0 = vadd.f32 %v1010_v50, %v2690_v59  ;;  %v1072_v48 = vadd.f32 %v1873_v55, %v2694_v53  ;;  %v1012_v8 = vpop.f32.mrb[1].mxu0  ;;  %v1063_v54 = vpop.f32.mrb[1].mxu1 }
 0x430   : > { %v1013_v4 = vadd.f32 %v1012_v8, %v2690_v59  ;;  %v1064_v33 = vadd.f32 %v1063_v54, %v2690_v59  ;;  %v1014_v3 = vpop.f32.mrb[2].mxu0  ;;  %v1874_v39 = vpop.f32.mrb[2].mxu1 }
 0x431   : > { %v1078_v57 = vadd.f32 3.0, %v1011_v0  ;;  %v1086_v46 = vadd.f32 3.0, %v1072_v48  ;;  %v1015_v11 = vadd.f32 %v1014_v3, %v2688_v13  ;;  %v1075_v35 = vadd.f32 %v1874_v39, %v2692_v2  ;;  %v1016_v1 = vpop.f32.mrb[3].mxu0  ;;  %v1066_v6 = vpop.f32.mrb[3].mxu1 }
 0x432   : > { %v1079_v40 = vadd.f32 3.0, %v1013_v4  ;;  %v1080_v29 = vadd.f32 3.0, %v1064_v33  ;;  %v1017_v62 = vadd.f32 %v1016_v1, %v2688_v13  ;;  %v1067_v51 = vadd.f32 %v1066_v6, %v2688_v13 }
 0x433   : > { %v1090_v37 = vmax.f32 %v1078_v57, 0.0  ;;  %v1098_v19 = vmax.f32 %v1086_v46, 0.0  ;;  %v1081_v34 = vadd.f32 3.0, %v1015_v11  ;;  %v1089_v10 = vadd.f32 3.0, %v1075_v35 }
 0x434   : > { %v1091_v9 = vmax.f32 %v1079_v40, 0.0  ;;  %v1092_v15 = vmax.f32 %v1080_v29, 0.0  ;;  %v1082_v21 = vadd.f32 3.0, %v1017_v62  ;;  %v1083_v32 = vadd.f32 3.0, %v1067_v51 }
 0x435   : > { %v1102_v38 = vmin.f32 %v1090_v37, 6.0  ;;  %v1110_v45 = vmin.f32 %v1098_v19, 6.0  ;;  %v1093_v14 = vmax.f32 %v1081_v34, 0.0  ;;  %v1101_v20 = vmax.f32 %v1089_v10, 0.0 }
 0x436   : > { %v1103_v22 = vmin.f32 %v1091_v9, 6.0  ;;  %v1104_v26 = vmin.f32 %v1092_v15, 6.0  ;;  %v1094_v12 = vmax.f32 %v1082_v21, 0.0  ;;  %v1095_v28 = vmax.f32 %v1083_v32, 0.0  ;;  %v1020_v36 = vpop.f32.mrb[4].mxu0 }
 0x437   : > { %v1114_v7 = vmul.f32 0.16666667, %v1102_v38  ;;  %v1122_v23 = vmul.f32 0.16666667, %v1110_v45  ;;  %v1105_v5 = vmin.f32 %v1093_v14, 6.0  ;;  %v1113_v27 = vmin.f32 %v1101_v20, 6.0 }
 0x438   : > { %v1115_v49 = vmul.f32 0.16666667, %v1103_v22  ;;  %v1116_v17 = vmul.f32 0.16666667, %v1104_v26  ;;  %v1106_v47 = vmin.f32 %v1094_v12, 6.0  ;;  %v1107_v30 = vmin.f32 %v1095_v28, 6.0 }
 0x439   : > { %v1126_v43 = vmul.f32 %v1114_v7, %v1011_v0  ;;  %v1134_v42 = vmul.f32 %v1122_v23, %v1072_v48  ;;  %v1117_v25 = vmul.f32 0.16666667, %v1105_v5  ;;  %v1125_v60 = vmul.f32 0.16666667, %v1113_v27  ;;  %v1022_v52 = vpop.f32.mrb[5].mxu0 }
 0x43a   : > { %v1127_v31 = vmul.f32 %v1115_v49, %v1013_v4  ;;  %v1128_v56 = vmul.f32 %v1116_v17, %v1064_v33  ;;  %v1118_v16 = vmul.f32 0.16666667, %v1106_v47  ;;  %v1119_v24 = vmul.f32 0.16666667, %v1107_v30  ;;  %v1024_v61 = vpop.f32.mrb[6].mxu0 }
 0x43b   : > { %1138 = vst [vmem:[%s2708_s23] sm:$0xff] %v1126_v43  ;;  %1146 = vst.msk [vmem:[%s2708_s23 + $0x40] sm:$0xff] %vm872_vm8, %v1134_v42  ;;  %v1129_v41 = vmul.f32 %v1117_v25, %v1015_v11  ;;  %v1137_v63 = vmul.f32 %v1125_v60, %v1075_v35  ;;  %v1021_v58 = vadd.f32 %v1020_v36, %v2694_v53  ;;  %v1026_v44 = vpop.f32.mrb[7].mxu0 }
 0x43c   : > { %v1023_v18 = vadd.f32 %v1022_v52, %v2694_v53  ;;  %1139 = vst [vmem:[%s2708_s23 + $0x8] sm:$0xff] %v1127_v31  ;;  %1140 = vst.msk [vmem:[%s2708_s23 + $0x10] sm:$0xff] %vm872_vm8, %v1128_v56  ;;  %v1130_v50 = vmul.f32 %v1118_v16, %v1017_v62  ;;  %v1131_v55 = vmul.f32 %v1119_v24, %v1067_v51 }
 0x43d   : > { %v1025_v0 = vadd.f32 %v1024_v61, %v2692_v2  ;;  %v1027_v48 = vadd.f32 %v1026_v44, %v2692_v2  ;;  %1141 = vst [vmem:[%s2708_s23 + $0x18] sm:$0xff] %v1129_v41  ;;  %1149 = vst.msk [vmem:[%s2708_s23 + $0x58] sm:$0xff] %vm872_vm8, %v1137_v63  ;;  %v1084_v8 = vadd.f32 3.0, %v1021_v58 }
 0x43e   : > { %v1085_v54 = vadd.f32 3.0, %v1023_v18  ;;  %1142 = vst [vmem:[%s2708_s23 + $0x20] sm:$0xff] %v1130_v50  ;;  %1143 = vst.msk [vmem:[%s2708_s23 + $0x28] sm:$0xff] %vm872_vm8, %v1131_v55 }
 0x43f   : > { %v1087_v4 = vadd.f32 3.0, %v1025_v0  ;;  %v1088_v33 = vadd.f32 3.0, %v1027_v48  ;;  %v1096_v3 = vmax.f32 %v1084_v8, 0.0 }
 0x440   : > { %v1097_v39 = vmax.f32 %v1085_v54, 0.0 }
 0x441   : > { %v1099_v57 = vmax.f32 %v1087_v4, 0.0  ;;  %v1100_v46 = vmax.f32 %v1088_v33, 0.0  ;;  %v1108_v11 = vmin.f32 %v1096_v3, 6.0 }
 0x442   : > { %v1109_v35 = vmin.f32 %v1097_v39, 6.0 }
 0x443   : > { %v1111_v1 = vmin.f32 %v1099_v57, 6.0  ;;  %v1112_v6 = vmin.f32 %v1100_v46, 6.0  ;;  %v1120_v40 = vmul.f32 0.16666667, %v1108_v11 }
 0x444   : > { %v1121_v29 = vmul.f32 0.16666667, %v1109_v35 }
 0x445   : > { %v1123_v62 = vmul.f32 0.16666667, %v1111_v1  ;;  %v1124_v51 = vmul.f32 0.16666667, %v1112_v6  ;;  %v1132_v37 = vmul.f32 %v1120_v40, %v1021_v58 }
 0x446   : > { %v1133_v19 = vmul.f32 %v1121_v29, %v1023_v18 }
 0x447   : > { %v1135_v34 = vmul.f32 %v1123_v62, %v1025_v0  ;;  %v1136_v10 = vmul.f32 %v1124_v51, %v1027_v48  ;;  %1144 = vst [vmem:[%s2708_s23 + $0x30] sm:$0xff] %v1132_v37 }
 0x448   : > { %1145 = vst [vmem:[%s2708_s23 + $0x38] sm:$0xff] %v1133_v19 }
 0x449   : > { %1147 = vst [vmem:[%s2708_s23 + $0x48] sm:$0xff] %v1135_v34  ;;  %1148 = vst [vmem:[%s2708_s23 + $0x50] sm:$0xff] %v1136_v10 }
 0x46b   : > { %v1625_v9 = vpop.f32.mrb[4].mxu1  ;;  %v1879_v15 = vpop.f32.mrb[8].mxu0 }
 0x46c   : > { %v1626_v21 = vadd.f32 %v1625_v9, %v2690_v59  ;;  %v1687_v32 = vadd.f32 %v1879_v15, %v2694_v53  ;;  %v1627_v38 = vpop.f32.mrb[5].mxu1  ;;  %v1678_v45 = vpop.f32.mrb[9].mxu0 }
 0x46d   : > { %v1628_v14 = vadd.f32 %v1627_v38, %v2690_v59  ;;  %v1679_v20 = vadd.f32 %v1678_v45, %v2690_v59  ;;  %v1629_v22 = vpop.f32.mrb[6].mxu1  ;;  %v1880_v26 = vpop.f32.mrb[10].mxu0 }
 0x46e   : > { %v1693_v12 = vadd.f32 3.0, %v1626_v21  ;;  %v1701_v28 = vadd.f32 3.0, %v1687_v32  ;;  %v1630_v36 = vadd.f32 %v1629_v22, %v2688_v13  ;;  %v1690_v7 = vadd.f32 %v1880_v26, %v2692_v2  ;;  %v1631_v23 = vpop.f32.mrb[7].mxu1  ;;  %v1681_v5 = vpop.f32.mrb[11].mxu0 }
 0x46f   : > { %v1694_v27 = vadd.f32 3.0, %v1628_v14  ;;  %v1695_v49 = vadd.f32 3.0, %v1679_v20  ;;  %v1632_v17 = vadd.f32 %v1631_v23, %v2688_v13  ;;  %v1682_v47 = vadd.f32 %v1681_v5, %v2688_v13 }
 0x470   : > { %v1705_v30 = vmax.f32 %v1693_v12, 0.0  ;;  %v1713_v43 = vmax.f32 %v1701_v28, 0.0  ;;  %v1696_v42 = vadd.f32 3.0, %v1630_v36  ;;  %v1704_v59 = vadd.f32 3.0, %v1690_v7 }
 0x471   : > { %v1706_v25 = vmax.f32 %v1694_v27, 0.0  ;;  %v1707_v60 = vmax.f32 %v1695_v49, 0.0  ;;  %v1697_v52 = vadd.f32 3.0, %v1632_v17  ;;  %v1698_v31 = vadd.f32 3.0, %v1682_v47 }
 0x472   : > { %v1717_v56 = vmin.f32 %v1705_v30, 6.0  ;;  %v1725_v16 = vmin.f32 %v1713_v43, 6.0  ;;  %v1708_v24 = vmax.f32 %v1696_v42, 0.0  ;;  %v1716_v61 = vmax.f32 %v1704_v59, 0.0 }
 0x473   : > { %v1718_v41 = vmin.f32 %v1706_v25, 6.0  ;;  %v1719_v63 = vmin.f32 %v1707_v60, 6.0  ;;  %v1709_v58 = vmax.f32 %v1697_v52, 0.0  ;;  %v1710_v18 = vmax.f32 %v1698_v31, 0.0  ;;  %v1635_v44 = vpop.f32.mrb[8].mxu1 }
 0x474   : > { %v1729_v50 = vmul.f32 0.16666667, %v1717_v56  ;;  %v1737_v55 = vmul.f32 0.16666667, %v1725_v16  ;;  %v1720_v13 = vmin.f32 %v1708_v24, 6.0  ;;  %v1728_v0 = vmin.f32 %v1716_v61, 6.0 }
 0x475   : > { %v1730_v48 = vmul.f32 0.16666667, %v1718_v41  ;;  %v1731_v8 = vmul.f32 0.16666667, %v1719_v63  ;;  %v1721_v54 = vmin.f32 %v1709_v58, 6.0  ;;  %v1722_v4 = vmin.f32 %v1710_v18, 6.0 }
 0x476   : > { %v1741_v33 = vmul.f32 %v1729_v50, %v1626_v21  ;;  %v1749_v3 = vmul.f32 %v1737_v55, %v1687_v32  ;;  %v1732_v39 = vmul.f32 0.16666667, %v1720_v13  ;;  %v1740_v57 = vmul.f32 0.16666667, %v1728_v0  ;;  %v1637_v46 = vpop.f32.mrb[9].mxu1 }
 0x477   : > { %v1742_v11 = vmul.f32 %v1730_v48, %v1628_v14  ;;  %v1743_v35 = vmul.f32 %v1731_v8, %v1679_v20  ;;  %v1733_v1 = vmul.f32 0.16666667, %v1721_v54  ;;  %v1734_v6 = vmul.f32 0.16666667, %v1722_v4  ;;  %v1639_v40 = vpop.f32.mrb[10].mxu1 }
 0x478   : > { %1849 = vst [vmem:[%s2708_s23 + $0x60] sm:$0xff] %v1741_v33  ;;  %1857 = vst.msk [vmem:[%s2708_s23 + $0xa0] sm:$0xff] %vm872_vm8, %v1749_v3  ;;  %v1744_v29 = vmul.f32 %v1732_v39, %v1630_v36  ;;  %v1752_v62 = vmul.f32 %v1740_v57, %v1690_v7  ;;  %v1636_v51 = vadd.f32 %v1635_v44, %v2694_v53  ;;  %v1641_v19 = vpop.f32.mrb[11].mxu1 }
 0x479   : > { %v1638_v37 = vadd.f32 %v1637_v46, %v2694_v53  ;;  %1850 = vst [vmem:[%s2708_s23 + $0x68] sm:$0xff] %v1742_v11  ;;  %1851 = vst.msk [vmem:[%s2708_s23 + $0x70] sm:$0xff] %vm872_vm8, %v1743_v35  ;;  %v1745_v34 = vmul.f32 %v1733_v1, %v1632_v17  ;;  %v1746_v10 = vmul.f32 %v1734_v6, %v1682_v47 }
 0x47a   : > { %v1640_v9 = vadd.f32 %v1639_v40, %v2692_v2  ;;  %v1642_v15 = vadd.f32 %v1641_v19, %v2692_v2  ;;  %1852 = vst [vmem:[%s2708_s23 + $0x78] sm:$0xff] %v1744_v29  ;;  %1860 = vst.msk [vmem:[%s2708_s23 + $0xb8] sm:$0xff] %vm872_vm8, %v1752_v62  ;;  %v1699_v21 = vadd.f32 3.0, %v1636_v51 }
 0x47b   : > { %v1700_v32 = vadd.f32 3.0, %v1638_v37  ;;  %1853 = vst [vmem:[%s2708_s23 + $0x80] sm:$0xff] %v1745_v34  ;;  %1854 = vst.msk [vmem:[%s2708_s23 + $0x88] sm:$0xff] %vm872_vm8, %v1746_v10 }
 0x47c   : > { %v1702_v38 = vadd.f32 3.0, %v1640_v9  ;;  %v1703_v53 = vadd.f32 3.0, %v1642_v15  ;;  %v1711_v45 = vmax.f32 %v1699_v21, 0.0 }
 0x47d   : > { %v1712_v14 = vmax.f32 %v1700_v32, 0.0 }
 0x47e   : > { %v1714_v20 = vmax.f32 %v1702_v38, 0.0  ;;  %v1715_v22 = vmax.f32 %v1703_v53, 0.0  ;;  %v1723_v26 = vmin.f32 %v1711_v45, 6.0 }
 0x47f   : > { %v1724_v2 = vmin.f32 %v1712_v14, 6.0 }
 0x480   : > { %v1726_v12 = vmin.f32 %v1714_v20, 6.0  ;;  %v1727_v28 = vmin.f32 %v1715_v22, 6.0  ;;  %v1735_v36 = vmul.f32 0.16666667, %v1723_v26 }
 0x481   : > { %v1736_v7 = vmul.f32 0.16666667, %v1724_v2 }
 0x482   : > { %v1738_v23 = vmul.f32 0.16666667, %v1726_v12  ;;  %v1739_v5 = vmul.f32 0.16666667, %v1727_v28  ;;  %v1747_v27 = vmul.f32 %v1735_v36, %v1636_v51 }
 0x483   : > { %v1748_v49 = vmul.f32 %v1736_v7, %v1638_v37 }
 0x484   : > { %v1750_v17 = vmul.f32 %v1738_v23, %v1640_v9  ;;  %v1751_v47 = vmul.f32 %v1739_v5, %v1642_v15  ;;  %1855 = vst [vmem:[%s2708_s23 + $0x90] sm:$0xff] %v1747_v27 }
 0x485   : > { %1856 = vst [vmem:[%s2708_s23 + $0x98] sm:$0xff] %v1748_v49 }
 0x486   : > { %1858 = vst [vmem:[%s2708_s23 + $0xa8] sm:$0xff] %v1750_v17  ;;  %1859 = vst [vmem:[%s2708_s23 + $0xb0] sm:$0xff] %v1751_v47 }
 0x487 PF: > { %s20_s13 = sadd.s32 1, %s1930_s13  }
 0x488   : > { %p17_p4 = scmp.ge.s32.totalorder %s20_s13, 6  }
 0x48a   :  { %19 = sbr.rel (!%p17_p4) target bundleno = 1 (0x1), region = 92 }

</bundles_post_ra>
